<compile_context>
chip_gen: v7x
topology: tpu7x:2x2x1
jax: 0.10.0
libtpu: 0.0.40
codegen_flags: <defaults>
</compile_context>

<pallas_src>
import jax
import jax.numpy as jnp
from jax.experimental import pallas as pl
from jax.experimental.pallas import tpu as pltpu


# ------------------------------ fused kernel ------------------------------- #

def _fused_forward_kernel(taps_ref, ones_ref, w1_ref, b1_ref, wh_ref, bh_ref,
                          wf_ref, bf_ref, act_ref, logits_ref, h1_ref):
    """One batch element per grid step.

    taps_ref  : [9, HW, C_in]    bf16  shifted 3x3 taps of the padded input
    ones_ref  : [1, HW]          bf16  (1/HW) row vector (GAP as a matmul)
    w1_ref    : [9, C_in, C_mid] bf16  conv1 weights, one tap per leading idx
    b1_ref    : [1, C_mid]       f32
    wh_ref    : [C_mid, C_head]  bf16  conv_head (1x1) weights
    bh_ref    : [1, C_head]      f32
    wf_ref    : [C_head, NCLS]   bf16  classifier weights
    bf_ref    : [1, NCLS]        f32
    act_ref   : [HW, C_head]     f32   hook activation (output)
    logits_ref: [1, 1, NCLS]     f32   logits (output)
    h1_ref    : [HW, C_mid]      f32   VMEM scratch
    """
    # conv1: 3x3 'same' conv as 9 accumulated taps, bf16 in / f32 accumulate.
    acc = jnp.dot(taps_ref[0], w1_ref[0], preferred_element_type=jnp.float32)
    for t in range(1, 9):
        acc = acc + jnp.dot(taps_ref[t], w1_ref[t],
                            preferred_element_type=jnp.float32)
    h1_ref[...] = jnp.maximum(acc + b1_ref[...], 0.0)        # f32 epilogue

    # conv_head: 1x1 conv == channel matmul (bf16 in / f32 accumulate).
    h2 = jnp.dot(h1_ref[...].astype(jnp.bfloat16), wh_ref[...],
                 preferred_element_type=jnp.float32)
    h2 = jnp.maximum(h2 + bh_ref[...], 0.0)

    # forward_hook: the conv_head activation is a kernel output (single store,
    # no extra HBM pass, no layout transpose).
    act_ref[...] = h2

    # Global average pool as a (1/HW)-ones row-vector matmul on the MXU, fused
    # with the classifier so the tiny FC never becomes its own launch.
    pooled = jnp.dot(ones_ref[...], h2.astype(jnp.bfloat16),
                     preferred_element_type=jnp.float32)      # [1, C_head]
    logits = jnp.dot(pooled.astype(jnp.bfloat16), wf_ref[...],
                     preferred_element_type=jnp.float32) + bf_ref[...]
    logits_ref[0] = logits


# ------------------------------- glue / model ------------------------------ #

def _prep_params(p):
    """PyTorch-layout weights -> kernel layout (bf16 matmul operands, f32 biases)."""
    c_mid, c_in = p["w1"].shape[0], p["w1"].shape[1]
    c_head = p["wh"].shape[0]
    ncls = p["wf"].shape[1]
    # conv1 [C_out, C_in, 3, 3] -> [9 (kh*3+kw), C_in, C_mid]
    w1_taps = jnp.transpose(p["w1"], (2, 3, 1, 0)).reshape(9, c_in, c_mid)
    # conv_head 1x1 [C_out, C_in, 1, 1] -> [C_mid, C_head]
    wh_2d = jnp.transpose(p["wh"], (2, 3, 1, 0)).reshape(c_mid, c_head)
    return dict(
        w1=w1_taps.astype(jnp.bfloat16),
        b1=p["b1"].reshape(1, c_mid).astype(jnp.float32),
        wh=wh_2d.astype(jnp.bfloat16),
        bh=p["bh"].reshape(1, c_head).astype(jnp.float32),
        wf=p["wf"].astype(jnp.bfloat16),
        bf=p["bf"].reshape(1, ncls).astype(jnp.float32),
    )


def hook_forward(x_nchw, prep):
    """Full fused forward: returns (logits.squeeze(), conv_head act [N,H,W,C])."""
    n, c_in, h, w = x_nchw.shape
    hw = h * w
    c_mid = prep["w1"].shape[2]
    c_head = prep["wh"].shape[1]
    ncls = prep["wf"].shape[1]

    # Shifted 3x3 taps of the zero-padded NHWC input: [9, N*HW, C_in] (bf16).
    # TODO(synk): at real EfficientNet scale this tap extraction should move
    # in-kernel (slice a padded NHWC VMEM tile) to avoid the 9x-duplicated HBM
    # tensor; at 16x16x4 it is ~36 KiB and negligible.
    x_nhwc = jnp.transpose(x_nchw, (0, 2, 3, 1))
    xp = jnp.pad(x_nhwc, ((0, 0), (1, 1), (1, 1), (0, 0)))
    taps = jnp.stack(
        [xp[:, kh:kh + h, kw:kw + w, :].reshape(n * hw, c_in)
         for kh in range(3) for kw in range(3)], axis=0).astype(jnp.bfloat16)

    ones_row = jnp.full((1, hw), 1.0 / hw, dtype=jnp.bfloat16)

    act_flat, logits3 = pl.pallas_call(
        _fused_forward_kernel,
        out_shape=(
            jax.ShapeDtypeStruct((n * hw, c_head), jnp.float32),   # activation
            jax.ShapeDtypeStruct((n, 1, ncls), jnp.float32),       # logits
        ),
        grid=(n,),
        in_specs=[
            pl.BlockSpec((9, hw, c_in), lambda b: (0, b, 0)),      # taps
            pl.BlockSpec((1, hw), lambda b: (0, 0)),               # ones row
            pl.BlockSpec((9, c_in, c_mid), lambda b: (0, 0, 0)),   # w1
            pl.BlockSpec((1, c_mid), lambda b: (0, 0)),            # b1
            pl.BlockSpec((c_mid, c_head), lambda b: (0, 0)),       # wh
            pl.BlockSpec((1, c_head), lambda b: (0, 0)),           # bh
            pl.BlockSpec((c_head, ncls), lambda b: (0, 0)),        # wf
            pl.BlockSpec((1, ncls), lambda b: (0, 0)),             # bf
        ],
        out_specs=(
            pl.BlockSpec((hw, c_head), lambda b: (b, 0)),
            pl.BlockSpec((1, 1, ncls), lambda b: (b, 0, 0)),
        ),
        scratch_shapes=[pltpu.VMEM((hw, c_mid), jnp.float32)],
        compiler_params=pltpu.CompilerParams(
            dimension_semantics=("parallel",)),   # v7x: 2 TCs split the batch
    )(taps, ones_row, prep["w1"], prep["b1"], prep["wh"], prep["bh"],
      prep["wf"], prep["bf"])

    act_nhwc = act_flat.reshape(n, h, w, c_head)   # channels-last, layout no-op
    logits = logits3.reshape(n, ncls)
    return jnp.squeeze(logits), act_nhwc           # same as x.squeeze() in PyTorch


def init_params(key, c_in=4, c_mid=32, c_head=64, num_classes=10):
    ks = jax.random.split(key, 6)
    scale = 0.1
    # conv1: PyTorch weight layout [C_out, C_in, 3, 3]
    w1 = scale * jax.random.normal(ks[0], (c_mid, c_in, 3, 3), jnp.float32)
    b1 = scale * jax.random.normal(ks[1], (c_mid,), jnp.float32)
    # conv_head: 1x1 conv, PyTorch layout [C_out, C_in, 1, 1]
    wh = scale * jax.random.normal(ks[2], (c_head, c_mid, 1, 1), jnp.float32)
    bh = scale * jax.random.normal(ks[3], (c_head,), jnp.float32)
    # classifier
    wf = scale * jax.random.normal(ks[4], (c_head, num_classes), jnp.float32)
    bf = scale * jax.random.normal(ks[5], (num_classes,), jnp.float32)
    return dict(w1=w1, b1=b1, wh=wh, bh=bh, wf=wf, bf=bf)


class Hook:
    """Mirror of the PyTorch `hook` module: runs the net, records the
    conv_head (target-layer) activations, returns `out.squeeze()`."""

    def __init__(self, params):
        self.params = params
        self._prep = _prep_params(params)
        self._fwd = jax.jit(hook_forward)
        self.activations = []  # filled by the "forward hook"
        # TODO(synk): backward_hook (grad_output capture) needs custom_vjp /
        # a backward kernel; not part of the forward-pass semantics.
        self.gradients = []

    def __call__(self, x_nchw):
        out, act = self._fwd(x_nchw, self._prep)
        # forward_hook: record target-layer output. Kept channels-last (NHWC)
        # per the perf review; PyTorch's hook would give NCHW — transpose
        # lazily only if a consumer needs it.
        self.activations.append(act)
        return out


# ---------------------------------- main ----------------------------------- #

if __name__ == "__main__":
    key = jax.random.PRNGKey(0)
    k_x, k_p = jax.random.split(key)

    x = jax.random.normal(k_x, (2, 4, 16, 16), jnp.float32)  # NCHW like PyTorch
    params = init_params(k_p, c_in=4, c_mid=32, c_head=64, num_classes=10)

    model = Hook(params)
    out = model(x)
    out = jax.block_until_ready(out)

    # Plain-JAX f32 reference of the same math (conv3x3+ReLU -> 1x1+ReLU ->
    # GAP -> FC).  The Pallas kernel uses bf16 matmul inputs with f32
    # accumulation, so tolerances are set at the ~1e-2 level.
    def ref_forward(x_nchw, p):
        xh = jnp.transpose(x_nchw, (0, 2, 3, 1))
        n, h, w, c_in = xh.shape
        xp = jnp.pad(xh, ((0, 0), (1, 1), (1, 1), (0, 0)))
        pat = jnp.concatenate(
            [xp[:, kh:kh + h, kw:kw + w, :] for kh in range(3) for kw in range(3)],
            axis=-1).reshape(n * h * w, 9 * c_in)
        w1 = jnp.transpose(p["w1"], (2, 3, 1, 0)).reshape(9 * c_in, -1)
        h1 = jnp.maximum(pat @ w1 + p["b1"], 0.0)
        wh = jnp.transpose(p["wh"], (2, 3, 1, 0)).reshape(p["wh"].shape[1], -1)
        h2 = jnp.maximum(h1 @ wh + p["bh"], 0.0)
        pooled = jnp.mean(h2.reshape(n, h * w, -1), axis=1)
        logits = pooled @ p["wf"] + p["bf"]
        return jnp.squeeze(logits), h2.reshape(n, h, w, -1)

    ref_out, ref_act = ref_forward(x, params)
    assert out.shape == ref_out.shape
    assert jnp.allclose(out, ref_out, atol=2e-2, rtol=2e-2)

    act = model.activations[0]
    assert act.shape == (2, 16, 16, 64)            # NHWC conv_head activation
    assert jnp.allclose(act, ref_act, atol=3e-2, rtol=3e-2)

    print("KERNEL_OK")
</pallas_src>

<mosaic_0001>
module attributes {stable_mosaic.version = 11 : i64} {
  func.func @_fused_forward_kernel(%arg0: i32, %arg1: memref<9x256x4xbf16, #tpu.memory_space<vmem>>, %arg2: memref<1x256xbf16, #tpu.memory_space<vmem>>, %arg3: memref<9x4x32xbf16, #tpu.memory_space<vmem>>, %arg4: memref<1x32xf32, #tpu.memory_space<vmem>>, %arg5: memref<32x64xbf16, #tpu.memory_space<vmem>>, %arg6: memref<1x64xf32, #tpu.memory_space<vmem>>, %arg7: memref<64x10xbf16, #tpu.memory_space<vmem>>, %arg8: memref<1x10xf32, #tpu.memory_space<vmem>>, %arg9: memref<256x64xf32, #tpu.memory_space<vmem>>, %arg10: memref<1x1x10xf32, #tpu.memory_space<vmem>>, %arg11: memref<256x32xf32, #tpu.memory_space<vmem>>) attributes {dimension_semantics = [#tpu.dimension_semantics<parallel>], iteration_bounds = array<i64: 2>, scalar_prefetch = 0 : i64, scratch_operands = 1 : i64, tpu.core_type = #tpu.core_type<tc>, window_params = [{transform_indices = @transform_0, window_bounds = array<i64: 9, 256, 4>}, {pipeline_mode = #tpu.pipeline_mode<synchronous>, transform_indices = @transform_1, window_bounds = array<i64: 1, 256>}, {pipeline_mode = #tpu.pipeline_mode<synchronous>, transform_indices = @transform_2, window_bounds = array<i64: 9, 4, 32>}, {pipeline_mode = #tpu.pipeline_mode<synchronous>, transform_indices = @transform_3, window_bounds = array<i64: 1, 32>}, {pipeline_mode = #tpu.pipeline_mode<synchronous>, transform_indices = @transform_4, window_bounds = array<i64: 32, 64>}, {pipeline_mode = #tpu.pipeline_mode<synchronous>, transform_indices = @transform_5, window_bounds = array<i64: 1, 64>}, {pipeline_mode = #tpu.pipeline_mode<synchronous>, transform_indices = @transform_6, window_bounds = array<i64: 64, 10>}, {pipeline_mode = #tpu.pipeline_mode<synchronous>, transform_indices = @transform_7, window_bounds = array<i64: 1, 10>}, {transform_indices = @transform_8, window_bounds = array<i64: 256, 64>}, {transform_indices = @transform_9, window_bounds = array<i64: 1, 1, 10>}]} {
    %c0 = arith.constant 0 : index
    %c0_0 = arith.constant 0 : index
    %c0_1 = arith.constant 0 : index
    %0 = vector.load %arg1[%c0, %c0_0, %c0_1] : memref<9x256x4xbf16, #tpu.memory_space<vmem>>, vector<1x256x4xbf16>
    %1 = vector.shape_cast %0 : vector<1x256x4xbf16> to vector<256x4xbf16>
    %c0_2 = arith.constant 0 : index
    %c0_3 = arith.constant 0 : index
    %c0_4 = arith.constant 0 : index
    %2 = vector.load %arg3[%c0_2, %c0_3, %c0_4] : memref<9x4x32xbf16, #tpu.memory_space<vmem>>, vector<1x4x32xbf16>
    %3 = vector.shape_cast %2 : vector<1x4x32xbf16> to vector<4x32xbf16>
    %cst = arith.constant dense<0.000000e+00> : vector<256x32xf32>
    %4 = tpu.matmul %1, %3, %cst {dimension_numbers = #tpu.dot_dimension_numbers<[1], [0], [0], [1], [0, 0, 1, 1], [], []>} : vector<256x4xbf16>, vector<4x32xbf16>, vector<256x32xf32> -> vector<256x32xf32>
    %c1 = arith.constant 1 : index
    %c0_5 = arith.constant 0 : index
    %c0_6 = arith.constant 0 : index
    %5 = vector.load %arg1[%c1, %c0_5, %c0_6] : memref<9x256x4xbf16, #tpu.memory_space<vmem>>, vector<1x256x4xbf16>
    %6 = vector.shape_cast %5 : vector<1x256x4xbf16> to vector<256x4xbf16>
    %c1_7 = arith.constant 1 : index
    %c0_8 = arith.constant 0 : index
    %c0_9 = arith.constant 0 : index
    %7 = vector.load %arg3[%c1_7, %c0_8, %c0_9] : memref<9x4x32xbf16, #tpu.memory_space<vmem>>, vector<1x4x32xbf16>
    %8 = vector.shape_cast %7 : vector<1x4x32xbf16> to vector<4x32xbf16>
    %cst_10 = arith.constant dense<0.000000e+00> : vector<256x32xf32>
    %9 = tpu.matmul %6, %8, %cst_10 {dimension_numbers = #tpu.dot_dimension_numbers<[1], [0], [0], [1], [0, 0, 1, 1], [], []>} : vector<256x4xbf16>, vector<4x32xbf16>, vector<256x32xf32> -> vector<256x32xf32>
    %10 = arith.addf %4, %9 : vector<256x32xf32>
    %c2 = arith.constant 2 : index
    %c0_11 = arith.constant 0 : index
    %c0_12 = arith.constant 0 : index
    %11 = vector.load %arg1[%c2, %c0_11, %c0_12] : memref<9x256x4xbf16, #tpu.memory_space<vmem>>, vector<1x256x4xbf16>
    %12 = vector.shape_cast %11 : vector<1x256x4xbf16> to vector<256x4xbf16>
    %c2_13 = arith.constant 2 : index
    %c0_14 = arith.constant 0 : index
    %c0_15 = arith.constant 0 : index
    %13 = vector.load %arg3[%c2_13, %c0_14, %c0_15] : memref<9x4x32xbf16, #tpu.memory_space<vmem>>, vector<1x4x32xbf16>
    %14 = vector.shape_cast %13 : vector<1x4x32xbf16> to vector<4x32xbf16>
    %cst_16 = arith.constant dense<0.000000e+00> : vector<256x32xf32>
    %15 = tpu.matmul %12, %14, %cst_16 {dimension_numbers = #tpu.dot_dimension_numbers<[1], [0], [0], [1], [0, 0, 1, 1], [], []>} : vector<256x4xbf16>, vector<4x32xbf16>, vector<256x32xf32> -> vector<256x32xf32>
    %16 = arith.addf %10, %15 : vector<256x32xf32>
    %c3 = arith.constant 3 : index
    %c0_17 = arith.constant 0 : index
    %c0_18 = arith.constant 0 : index
    %17 = vector.load %arg1[%c3, %c0_17, %c0_18] : memref<9x256x4xbf16, #tpu.memory_space<vmem>>, vector<1x256x4xbf16>
    %18 = vector.shape_cast %17 : vector<1x256x4xbf16> to vector<256x4xbf16>
    %c3_19 = arith.constant 3 : index
    %c0_20 = arith.constant 0 : index
    %c0_21 = arith.constant 0 : index
    %19 = vector.load %arg3[%c3_19, %c0_20, %c0_21] : memref<9x4x32xbf16, #tpu.memory_space<vmem>>, vector<1x4x32xbf16>
    %20 = vector.shape_cast %19 : vector<1x4x32xbf16> to vector<4x32xbf16>
    %cst_22 = arith.constant dense<0.000000e+00> : vector<256x32xf32>
    %21 = tpu.matmul %18, %20, %cst_22 {dimension_numbers = #tpu.dot_dimension_numbers<[1], [0], [0], [1], [0, 0, 1, 1], [], []>} : vector<256x4xbf16>, vector<4x32xbf16>, vector<256x32xf32> -> vector<256x32xf32>
    %22 = arith.addf %16, %21 : vector<256x32xf32>
    %c4 = arith.constant 4 : index
    %c0_23 = arith.constant 0 : index
    %c0_24 = arith.constant 0 : index
    %23 = vector.load %arg1[%c4, %c0_23, %c0_24] : memref<9x256x4xbf16, #tpu.memory_space<vmem>>, vector<1x256x4xbf16>
    %24 = vector.shape_cast %23 : vector<1x256x4xbf16> to vector<256x4xbf16>
    %c4_25 = arith.constant 4 : index
    %c0_26 = arith.constant 0 : index
    %c0_27 = arith.constant 0 : index
    %25 = vector.load %arg3[%c4_25, %c0_26, %c0_27] : memref<9x4x32xbf16, #tpu.memory_space<vmem>>, vector<1x4x32xbf16>
    %26 = vector.shape_cast %25 : vector<1x4x32xbf16> to vector<4x32xbf16>
    %cst_28 = arith.constant dense<0.000000e+00> : vector<256x32xf32>
    %27 = tpu.matmul %24, %26, %cst_28 {dimension_numbers = #tpu.dot_dimension_numbers<[1], [0], [0], [1], [0, 0, 1, 1], [], []>} : vector<256x4xbf16>, vector<4x32xbf16>, vector<256x32xf32> -> vector<256x32xf32>
    %28 = arith.addf %22, %27 : vector<256x32xf32>
    %c5 = arith.constant 5 : index
    %c0_29 = arith.constant 0 : index
    %c0_30 = arith.constant 0 : index
    %29 = vector.load %arg1[%c5, %c0_29, %c0_30] : memref<9x256x4xbf16, #tpu.memory_space<vmem>>, vector<1x256x4xbf16>
    %30 = vector.shape_cast %29 : vector<1x256x4xbf16> to vector<256x4xbf16>
    %c5_31 = arith.constant 5 : index
    %c0_32 = arith.constant 0 : index
    %c0_33 = arith.constant 0 : index
    %31 = vector.load %arg3[%c5_31, %c0_32, %c0_33] : memref<9x4x32xbf16, #tpu.memory_space<vmem>>, vector<1x4x32xbf16>
    %32 = vector.shape_cast %31 : vector<1x4x32xbf16> to vector<4x32xbf16>
    %cst_34 = arith.constant dense<0.000000e+00> : vector<256x32xf32>
    %33 = tpu.matmul %30, %32, %cst_34 {dimension_numbers = #tpu.dot_dimension_numbers<[1], [0], [0], [1], [0, 0, 1, 1], [], []>} : vector<256x4xbf16>, vector<4x32xbf16>, vector<256x32xf32> -> vector<256x32xf32>
    %34 = arith.addf %28, %33 : vector<256x32xf32>
    %c6 = arith.constant 6 : index
    %c0_35 = arith.constant 0 : index
    %c0_36 = arith.constant 0 : index
    %35 = vector.load %arg1[%c6, %c0_35, %c0_36] : memref<9x256x4xbf16, #tpu.memory_space<vmem>>, vector<1x256x4xbf16>
    %36 = vector.shape_cast %35 : vector<1x256x4xbf16> to vector<256x4xbf16>
    %c6_37 = arith.constant 6 : index
    %c0_38 = arith.constant 0 : index
    %c0_39 = arith.constant 0 : index
    %37 = vector.load %arg3[%c6_37, %c0_38, %c0_39] : memref<9x4x32xbf16, #tpu.memory_space<vmem>>, vector<1x4x32xbf16>
    %38 = vector.shape_cast %37 : vector<1x4x32xbf16> to vector<4x32xbf16>
    %cst_40 = arith.constant dense<0.000000e+00> : vector<256x32xf32>
    %39 = tpu.matmul %36, %38, %cst_40 {dimension_numbers = #tpu.dot_dimension_numbers<[1], [0], [0], [1], [0, 0, 1, 1], [], []>} : vector<256x4xbf16>, vector<4x32xbf16>, vector<256x32xf32> -> vector<256x32xf32>
    %40 = arith.addf %34, %39 : vector<256x32xf32>
    %c7 = arith.constant 7 : index
    %c0_41 = arith.constant 0 : index
    %c0_42 = arith.constant 0 : index
    %41 = vector.load %arg1[%c7, %c0_41, %c0_42] : memref<9x256x4xbf16, #tpu.memory_space<vmem>>, vector<1x256x4xbf16>
    %42 = vector.shape_cast %41 : vector<1x256x4xbf16> to vector<256x4xbf16>
    %c7_43 = arith.constant 7 : index
    %c0_44 = arith.constant 0 : index
    %c0_45 = arith.constant 0 : index
    %43 = vector.load %arg3[%c7_43, %c0_44, %c0_45] : memref<9x4x32xbf16, #tpu.memory_space<vmem>>, vector<1x4x32xbf16>
    %44 = vector.shape_cast %43 : vector<1x4x32xbf16> to vector<4x32xbf16>
    %cst_46 = arith.constant dense<0.000000e+00> : vector<256x32xf32>
    %45 = tpu.matmul %42, %44, %cst_46 {dimension_numbers = #tpu.dot_dimension_numbers<[1], [0], [0], [1], [0, 0, 1, 1], [], []>} : vector<256x4xbf16>, vector<4x32xbf16>, vector<256x32xf32> -> vector<256x32xf32>
    %46 = arith.addf %40, %45 : vector<256x32xf32>
    %c8 = arith.constant 8 : index
    %c0_47 = arith.constant 0 : index
    %c0_48 = arith.constant 0 : index
    %47 = vector.load %arg1[%c8, %c0_47, %c0_48] : memref<9x256x4xbf16, #tpu.memory_space<vmem>>, vector<1x256x4xbf16>
    %48 = vector.shape_cast %47 : vector<1x256x4xbf16> to vector<256x4xbf16>
    %c8_49 = arith.constant 8 : index
    %c0_50 = arith.constant 0 : index
    %c0_51 = arith.constant 0 : index
    %49 = vector.load %arg3[%c8_49, %c0_50, %c0_51] : memref<9x4x32xbf16, #tpu.memory_space<vmem>>, vector<1x4x32xbf16>
    %50 = vector.shape_cast %49 : vector<1x4x32xbf16> to vector<4x32xbf16>
    %cst_52 = arith.constant dense<0.000000e+00> : vector<256x32xf32>
    %51 = tpu.matmul %48, %50, %cst_52 {dimension_numbers = #tpu.dot_dimension_numbers<[1], [0], [0], [1], [0, 0, 1, 1], [], []>} : vector<256x4xbf16>, vector<4x32xbf16>, vector<256x32xf32> -> vector<256x32xf32>
    %52 = arith.addf %46, %51 : vector<256x32xf32>
    %c0_53 = arith.constant 0 : index
    %c0_54 = arith.constant 0 : index
    %53 = vector.load %arg4[%c0_53, %c0_54] : memref<1x32xf32, #tpu.memory_space<vmem>>, vector<1x32xf32>
    %54 = vector.broadcast %53 : vector<1x32xf32> to vector<256x32xf32>
    %55 = arith.addf %52, %54 : vector<256x32xf32>
    %cst_55 = arith.constant 0.000000e+00 : f32
    %56 = vector.broadcast %cst_55 : f32 to vector<256x32xf32>
    %57 = arith.maximumf %55, %56 : vector<256x32xf32>
    %c0_56 = arith.constant 0 : index
    %c0_57 = arith.constant 0 : index
    %58 = vector.load %arg11[%c0_56, %c0_57] : memref<256x32xf32, #tpu.memory_space<vmem>>, vector<256x32xf32>
    tpu.vector_store %arg11[%c0_56, %c0_57], %57 {strides = array<i32>} : memref<256x32xf32, #tpu.memory_space<vmem>>, vector<256x32xf32>,
    %c0_58 = arith.constant 0 : index
    %c0_59 = arith.constant 0 : index
    %59 = vector.load %arg11[%c0_58, %c0_59] : memref<256x32xf32, #tpu.memory_space<vmem>>, vector<256x32xf32>
    %60 = arith.truncf %59 : vector<256x32xf32> to vector<256x32xbf16>
    %c0_60 = arith.constant 0 : index
    %c0_61 = arith.constant 0 : index
    %61 = vector.load %arg5[%c0_60, %c0_61] : memref<32x64xbf16, #tpu.memory_space<vmem>>, vector<32x64xbf16>
    %cst_62 = arith.constant dense<0.000000e+00> : vector<256x64xf32>
    %62 = tpu.matmul %60, %61, %cst_62 {dimension_numbers = #tpu.dot_dimension_numbers<[1], [0], [0], [1], [0, 0, 1, 1], [], []>} : vector<256x32xbf16>, vector<32x64xbf16>, vector<256x64xf32> -> vector<256x64xf32>
    %c0_63 = arith.constant 0 : index
    %c0_64 = arith.constant 0 : index
    %63 = vector.load %arg6[%c0_63, %c0_64] : memref<1x64xf32, #tpu.memory_space<vmem>>, vector<1x64xf32>
    %64 = vector.broadcast %63 : vector<1x64xf32> to vector<256x64xf32>
    %65 = arith.addf %62, %64 : vector<256x64xf32>
    %cst_65 = arith.constant 0.000000e+00 : f32
    %66 = vector.broadcast %cst_65 : f32 to vector<256x64xf32>
    %67 = arith.maximumf %65, %66 : vector<256x64xf32>
    %c0_66 = arith.constant 0 : index
    %c0_67 = arith.constant 0 : index
    %68 = vector.load %arg9[%c0_66, %c0_67] : memref<256x64xf32, #tpu.memory_space<vmem>>, vector<256x64xf32>
    tpu.vector_store %arg9[%c0_66, %c0_67], %67 {strides = array<i32>} : memref<256x64xf32, #tpu.memory_space<vmem>>, vector<256x64xf32>,
    %c0_68 = arith.constant 0 : index
    %c0_69 = arith.constant 0 : index
    %69 = vector.load %arg2[%c0_68, %c0_69] : memref<1x256xbf16, #tpu.memory_space<vmem>>, vector<1x256xbf16>
    %70 = arith.truncf %67 : vector<256x64xf32> to vector<256x64xbf16>
    %cst_70 = arith.constant dense<0.000000e+00> : vector<1x64xf32>
    %71 = tpu.matmul %69, %70, %cst_70 {dimension_numbers = #tpu.dot_dimension_numbers<[1], [0], [0], [1], [0, 0, 1, 1], [], []>} : vector<1x256xbf16>, vector<256x64xbf16>, vector<1x64xf32> -> vector<1x64xf32>
    %72 = arith.truncf %71 : vector<1x64xf32> to vector<1x64xbf16>
    %c0_71 = arith.constant 0 : index
    %c0_72 = arith.constant 0 : index
    %73 = vector.load %arg7[%c0_71, %c0_72] : memref<64x10xbf16, #tpu.memory_space<vmem>>, vector<64x10xbf16>
    %cst_73 = arith.constant dense<0.000000e+00> : vector<1x10xf32>
    %74 = tpu.matmul %72, %73, %cst_73 {dimension_numbers = #tpu.dot_dimension_numbers<[1], [0], [0], [1], [0, 0, 1, 1], [], []>} : vector<1x64xbf16>, vector<64x10xbf16>, vector<1x10xf32> -> vector<1x10xf32>
    %c0_74 = arith.constant 0 : index
    %c0_75 = arith.constant 0 : index
    %75 = vector.load %arg8[%c0_74, %c0_75] : memref<1x10xf32, #tpu.memory_space<vmem>>, vector<1x10xf32>
    %76 = arith.addf %74, %75 : vector<1x10xf32>
    %c0_76 = arith.constant 0 : index
    %c0_77 = arith.constant 0 : index
    %c0_78 = arith.constant 0 : index
    %77 = vector.load %arg10[%c0_76, %c0_77, %c0_78] : memref<1x1x10xf32, #tpu.memory_space<vmem>>, vector<1x1x10xf32>
    %78 = vector.shape_cast %77 : vector<1x1x10xf32> to vector<1x10xf32>
    %79 = vector.shape_cast %76 : vector<1x10xf32> to vector<1x1x10xf32>
    tpu.vector_store %arg10[%c0_76, %c0_77, %c0_78], %79 {strides = array<i32>} : memref<1x1x10xf32, #tpu.memory_space<vmem>>, vector<1x1x10xf32>,
    return
  }
  func.func @transform_0(%arg0: i32) -> (i32, i32, i32) {
    %c0_i32 = arith.constant 0 : i32
    %c0_i32_0 = arith.constant 0 : i32
    %c0_i32_1 = arith.constant 0 : i32
    return %c0_i32, %arg0, %c0_i32_0 : i32, i32, i32
  }
  func.func @transform_1(%arg0: i32) -> (i32, i32) {
    %c0_i32 = arith.constant 0 : i32
    %c0_i32_0 = arith.constant 0 : i32
    %c0_i32_1 = arith.constant 0 : i32
    return %c0_i32, %c0_i32_0 : i32, i32
  }
  func.func @transform_2(%arg0: i32) -> (i32, i32, i32) {
    %c0_i32 = arith.constant 0 : i32
    %c0_i32_0 = arith.constant 0 : i32
    %c0_i32_1 = arith.constant 0 : i32
    %c0_i32_2 = arith.constant 0 : i32
    return %c0_i32, %c0_i32_0, %c0_i32_1 : i32, i32, i32
  }
  func.func @transform_3(%arg0: i32) -> (i32, i32) {
    %c0_i32 = arith.constant 0 : i32
    %c0_i32_0 = arith.constant 0 : i32
    %c0_i32_1 = arith.constant 0 : i32
    return %c0_i32, %c0_i32_0 : i32, i32
  }
  func.func @transform_4(%arg0: i32) -> (i32, i32) {
    %c0_i32 = arith.constant 0 : i32
    %c0_i32_0 = arith.constant 0 : i32
    %c0_i32_1 = arith.constant 0 : i32
    return %c0_i32, %c0_i32_0 : i32, i32
  }
  func.func @transform_5(%arg0: i32) -> (i32, i32) {
    %c0_i32 = arith.constant 0 : i32
    %c0_i32_0 = arith.constant 0 : i32
    %c0_i32_1 = arith.constant 0 : i32
    return %c0_i32, %c0_i32_0 : i32, i32
  }
  func.func @transform_6(%arg0: i32) -> (i32, i32) {
    %c0_i32 = arith.constant 0 : i32
    %c0_i32_0 = arith.constant 0 : i32
    %c0_i32_1 = arith.constant 0 : i32
    return %c0_i32, %c0_i32_0 : i32, i32
  }
  func.func @transform_7(%arg0: i32) -> (i32, i32) {
    %c0_i32 = arith.constant 0 : i32
    %c0_i32_0 = arith.constant 0 : i32
    %c0_i32_1 = arith.constant 0 : i32
    return %c0_i32, %c0_i32_0 : i32, i32
  }
  func.func @transform_8(%arg0: i32) -> (i32, i32) {
    %c0_i32 = arith.constant 0 : i32
    %c0_i32_0 = arith.constant 0 : i32
    return %arg0, %c0_i32 : i32, i32
  }
  func.func @transform_9(%arg0: i32) -> (i32, i32, i32) {
    %c0_i32 = arith.constant 0 : i32
    %c0_i32_0 = arith.constant 0 : i32
    %c0_i32_1 = arith.constant 0 : i32
    return %arg0, %c0_i32, %c0_i32_0 : i32, i32, i32
  }
}

</mosaic_0001>

<bundles_post_ra>
// kernel: hook_forward.1
= control target key start
LH: loop header
LB: loop body
LE: loop exit
PB: predicated region body
PF: predicated region fallthrough
CT: control target
= control target key end

     0   :  { %s8315_s0 = inlined_call_operand.vmem [shape: bf16[9,512,4], index: 0, kind: input, shape index: {}]   ;;  %s8316_s1 = inlined_call_operand.vmem [shape: bf16[1,256], index: 1, kind: input, shape index: {}]   ;;  %s8317_s2 = inlined_call_operand.vmem [shape: bf16[9,4,32], index: 2, kind: input, shape index: {}]   ;;  %s8318_s3 = inlined_call_operand.vmem [shape: f32[1,32], index: 3, kind: input, shape index: {}]   ;;  %s8319_s4 = inlined_call_operand.vmem [shape: bf16[32,64], index: 4, kind: input, shape index: {}]   ;;  %s8320_s5 = inlined_call_operand.vmem [shape: f32[1,64], index: 5, kind: input, shape index: {}]   ;;  %s8321_s6 = inlined_call_operand.vmem [shape: bf16[64,10], index: 6, kind: input, shape index: {}]   ;;  %s8322_s7 = inlined_call_operand.vmem [shape: f32[1,10], index: 7, kind: input, shape index: {}]   ;;  %s8323_s8 = inlined_call_operand.hbm [shape: f32[512,64], index: 8, kind: output, shape index: {0}]   ;;  %s8324_s9 = inlined_call_operand.hbm [shape: f32[2,1,10], index: 9, kind: output, shape index: {1}]  }
   0x1   :  { %8325 = sst [smem:[#allocation10_spill]] %s8315_s0 }
   0x2   :  { %8326 = sst [smem:[#allocation11_spill]] %s8316_s1 }
   0x3   :  { %15 = vsyncpa [#allocation5], 0 }
   0x4   :  { %17 = vsyncpa [#allocation5 + $0x1], 0 }
   0x5   :  { %18 = vsyncpa [#allocation7], 0 }
   0x6   :  { %20 = vsyncpa [#allocation7 + $0x1], 0  ;;  %s7205_s30 = smov 0   ;;  %s7207_s10 = smov 0  }
   0x7   :  { %s7209_s11 = smov 0   ;;  %s7211_s12 = smov 0  }
   0x8 LB: > { %s7226_s13 = sadd.s32 4294967295, %s7146_s12   ;;  %s5438_s14 = sadd.s32 4294967294, %s7146_s12   ;;  %s7146_s12 = sphi %s7211_s12, %s8334_s12   ;;  %s7142_s11 = sphi %s7209_s11, %s8333_s11   ;;  %s7138_s10 = sphi %s7207_s10, %s8332_s10   ;;  %s7134_s30 = sphi %s7205_s30, %s8331_s30  }
   0x9   : > { %s7230_s15 = sadd.s32 1, %s7146_s12   ;;  %s33_s16 = sadd.s32 1, %s7142_s11 }
   0xa   : > { %s30_s17 = ssub.s32 %s7146_s12, %s7230_s15  ;;  %p40_p0 = scmp.ne.s32.totalorder %s7142_s11, %s7138_s10 }
   0xb   : > { %p31_p1 = scmp.eq.s32.totalorder %s30_s17, 0  ;;  %p41_p2 = scmp.eq.s32.totalorder %s7146_s12, 0 }
   0xc   : > { %p217_p3 = scmp.eq.s32.totalorder %s7226_s13, 1  ;;  %p222_p4 = scmp.ne.s32.totalorder %s7138_s10, %s7134_s30 }
   0xd   : > { %s7242_s18 = scalar_select %p31_p1, %s7142_s11, %s33_s16  }
   0xe   : > { %p42_p5 = por %p41_p2, %p40_p0  ;;  %p7244_p6 = por %p217_p3, %p40_p0 }
   0xf   : > { %p223_p7 = scmp.eq.s32.totalorder %s5438_s14, 1  ;;  %p5440_p9 = scmp.ge.s32.totalorder %s7146_s12, 2 }
  0x11   : > { %p7248_p8 = por %p223_p7, %p222_p4  ;;  %286 = sbr.rel (%p5440_p9) target bundleno = 107 (0x6b), region = 44 }
  0x18   : > { %289 = sbr.rel (!%p42_p5) target bundleno = 107 (0x6b), region = 48  ;;  %s291_s21 = sand.u32 (%p42_p5), 1, %s7142_s11  }
  0x19   : > { %s6029_s22 = sshll.u32 (%p42_p5), %s7146_s12, 7  ;;  %s6851_s23 = smul.u32 (%p42_p5), 1152, %s291_s21 }
  0x1a   : > { %s8329_s0 = sld [smem:[#allocation10_spill]] (%p42_p5) }
  0x1b   : > { %s7268_s27 = scalar_lea.vmem (%p42_p5), [#allocation3], %s6851_s23 }
  0x20   : > { %s7260_s26 = scalar_lea.vmem %s8329_s0, %s6029_s22 }
  0x21   : > { %v312_v0 = vld [vmem:[%s7260_s26] sm:$0xff]   ;;  %v316_v1 = vld [vmem:[%s7260_s26 + $0x8] sm:$0xff]   ;;  %v320_v2 = vld [vmem:[%s7260_s26 + $0x10] sm:$0xff]  }
  0x22   : > { %v324_v3 = vld [vmem:[%s7260_s26 + $0x18] sm:$0xff]   ;;  %v328_v4 = vld [vmem:[%s7260_s26 + $0x20] sm:$0xff]   ;;  %v332_v5 = vld [vmem:[%s7260_s26 + $0x28] sm:$0xff]   ;;  %313 = vst [vmem:[%s7268_s27] sm:$0xff] %v312_v0  }
  0x23   : > { %317 = vst [vmem:[%s7268_s27 + $0x8] sm:$0xff] %v316_v1   ;;  %321 = vst [vmem:[%s7268_s27 + $0x10] sm:$0xff] %v320_v2   ;;  %v336_v6 = vld [vmem:[%s7260_s26 + $0x30] sm:$0xff]   ;;  %v340_v7 = vld [vmem:[%s7260_s26 + $0x38] sm:$0xff]  }
  0x24   : > { %325 = vst [vmem:[%s7268_s27 + $0x18] sm:$0xff] %v324_v3   ;;  %329 = vst [vmem:[%s7268_s27 + $0x20] sm:$0xff] %v328_v4   ;;  %v344_v8 = vld [vmem:[%s7260_s26 + $0x40] sm:$0xff]   ;;  %v348_v9 = vld [vmem:[%s7260_s26 + $0x48] sm:$0xff]  }
  0x25   : > { %333 = vst [vmem:[%s7268_s27 + $0x28] sm:$0xff] %v332_v5   ;;  %337 = vst [vmem:[%s7268_s27 + $0x30] sm:$0xff] %v336_v6   ;;  %v352_v10 = vld [vmem:[%s7260_s26 + $0x50] sm:$0xff]   ;;  %v356_v11 = vld [vmem:[%s7260_s26 + $0x58] sm:$0xff]  }
  0x26   : > { %341 = vst [vmem:[%s7268_s27 + $0x38] sm:$0xff] %v340_v7   ;;  %345 = vst [vmem:[%s7268_s27 + $0x40] sm:$0xff] %v344_v8   ;;  %v360_v12 = vld [vmem:[%s7260_s26 + $0x60] sm:$0xff]   ;;  %v364_v13 = vld [vmem:[%s7260_s26 + $0x68] sm:$0xff]  }
  0x27   : > { %349 = vst [vmem:[%s7268_s27 + $0x48] sm:$0xff] %v348_v9   ;;  %353 = vst [vmem:[%s7268_s27 + $0x50] sm:$0xff] %v352_v10   ;;  %v368_v14 = vld [vmem:[%s7260_s26 + $0x70] sm:$0xff]   ;;  %v372_v15 = vld [vmem:[%s7260_s26 + $0x78] sm:$0xff]  }
  0x28   : > { %357 = vst [vmem:[%s7268_s27 + $0x58] sm:$0xff] %v356_v11   ;;  %361 = vst [vmem:[%s7268_s27 + $0x60] sm:$0xff] %v360_v12   ;;  %v376_v16 = vld [vmem:[%s7260_s26 + $0x100] sm:$0xff]   ;;  %v380_v17 = vld [vmem:[%s7260_s26 + $0x108] sm:$0xff]  }
  0x29   : > { %365 = vst [vmem:[%s7268_s27 + $0x68] sm:$0xff] %v364_v13   ;;  %369 = vst [vmem:[%s7268_s27 + $0x70] sm:$0xff] %v368_v14   ;;  %v384_v18 = vld [vmem:[%s7260_s26 + $0x110] sm:$0xff]   ;;  %v388_v19 = vld [vmem:[%s7260_s26 + $0x118] sm:$0xff]  }
  0x2a   : > { %373 = vst [vmem:[%s7268_s27 + $0x78] sm:$0xff] %v372_v15   ;;  %377 = vst [vmem:[%s7268_s27 + $0x80] sm:$0xff] %v376_v16   ;;  %v392_v20 = vld [vmem:[%s7260_s26 + $0x120] sm:$0xff]   ;;  %v396_v21 = vld [vmem:[%s7260_s26 + $0x128] sm:$0xff]  }
  0x2b   : > { %381 = vst [vmem:[%s7268_s27 + $0x88] sm:$0xff] %v380_v17   ;;  %385 = vst [vmem:[%s7268_s27 + $0x90] sm:$0xff] %v384_v18   ;;  %v400_v22 = vld [vmem:[%s7260_s26 + $0x130] sm:$0xff]   ;;  %v404_v23 = vld [vmem:[%s7260_s26 + $0x138] sm:$0xff]  }
  0x2c   : > { %389 = vst [vmem:[%s7268_s27 + $0x98] sm:$0xff] %v388_v19   ;;  %393 = vst [vmem:[%s7268_s27 + $0xa0] sm:$0xff] %v392_v20   ;;  %v408_v24 = vld [vmem:[%s7260_s26 + $0x140] sm:$0xff]   ;;  %v412_v25 = vld [vmem:[%s7260_s26 + $0x148] sm:$0xff]  }
  0x2d   : > { %397 = vst [vmem:[%s7268_s27 + $0xa8] sm:$0xff] %v396_v21   ;;  %401 = vst [vmem:[%s7268_s27 + $0xb0] sm:$0xff] %v400_v22   ;;  %v416_v26 = vld [vmem:[%s7260_s26 + $0x150] sm:$0xff]   ;;  %v420_v27 = vld [vmem:[%s7260_s26 + $0x158] sm:$0xff]  }
  0x2e   : > { %405 = vst [vmem:[%s7268_s27 + $0xb8] sm:$0xff] %v404_v23   ;;  %409 = vst [vmem:[%s7268_s27 + $0xc0] sm:$0xff] %v408_v24   ;;  %v424_v28 = vld [vmem:[%s7260_s26 + $0x160] sm:$0xff]   ;;  %v428_v29 = vld [vmem:[%s7260_s26 + $0x168] sm:$0xff]  }
  0x2f   : > { %413 = vst [vmem:[%s7268_s27 + $0xc8] sm:$0xff] %v412_v25   ;;  %417 = vst [vmem:[%s7268_s27 + $0xd0] sm:$0xff] %v416_v26   ;;  %v432_v30 = vld [vmem:[%s7260_s26 + $0x170] sm:$0xff]   ;;  %v436_v31 = vld [vmem:[%s7260_s26 + $0x178] sm:$0xff]  }
  0x30   : > { %421 = vst [vmem:[%s7268_s27 + $0xd8] sm:$0xff] %v420_v27   ;;  %425 = vst [vmem:[%s7268_s27 + $0xe0] sm:$0xff] %v424_v28   ;;  %v440_v32 = vld [vmem:[%s7260_s26 + $0x200] sm:$0xff]   ;;  %v444_v33 = vld [vmem:[%s7260_s26 + $0x208] sm:$0xff]  }
  0x31   : > { %429 = vst [vmem:[%s7268_s27 + $0xe8] sm:$0xff] %v428_v29   ;;  %433 = vst [vmem:[%s7268_s27 + $0xf0] sm:$0xff] %v432_v30   ;;  %v448_v34 = vld [vmem:[%s7260_s26 + $0x210] sm:$0xff]   ;;  %v452_v35 = vld [vmem:[%s7260_s26 + $0x218] sm:$0xff]  }
  0x32   : > { %437 = vst [vmem:[%s7268_s27 + $0xf8] sm:$0xff] %v436_v31   ;;  %441 = vst [vmem:[%s7268_s27 + $0x100] sm:$0xff] %v440_v32   ;;  %v456_v36 = vld [vmem:[%s7260_s26 + $0x220] sm:$0xff]   ;;  %v460_v37 = vld [vmem:[%s7260_s26 + $0x228] sm:$0xff]  }
  0x33   : > { %445 = vst [vmem:[%s7268_s27 + $0x108] sm:$0xff] %v444_v33   ;;  %449 = vst [vmem:[%s7268_s27 + $0x110] sm:$0xff] %v448_v34   ;;  %v464_v38 = vld [vmem:[%s7260_s26 + $0x230] sm:$0xff]   ;;  %v468_v39 = vld [vmem:[%s7260_s26 + $0x238] sm:$0xff]  }
  0x34   : > { %453 = vst [vmem:[%s7268_s27 + $0x118] sm:$0xff] %v452_v35   ;;  %457 = vst [vmem:[%s7268_s27 + $0x120] sm:$0xff] %v456_v36   ;;  %v472_v40 = vld [vmem:[%s7260_s26 + $0x240] sm:$0xff]   ;;  %v476_v41 = vld [vmem:[%s7260_s26 + $0x248] sm:$0xff]  }
  0x35   : > { %461 = vst [vmem:[%s7268_s27 + $0x128] sm:$0xff] %v460_v37   ;;  %465 = vst [vmem:[%s7268_s27 + $0x130] sm:$0xff] %v464_v38   ;;  %v480_v42 = vld [vmem:[%s7260_s26 + $0x250] sm:$0xff]   ;;  %v484_v43 = vld [vmem:[%s7260_s26 + $0x258] sm:$0xff]  }
  0x36   : > { %469 = vst [vmem:[%s7268_s27 + $0x138] sm:$0xff] %v468_v39   ;;  %473 = vst [vmem:[%s7268_s27 + $0x140] sm:$0xff] %v472_v40   ;;  %v488_v44 = vld [vmem:[%s7260_s26 + $0x260] sm:$0xff]   ;;  %v492_v45 = vld [vmem:[%s7260_s26 + $0x268] sm:$0xff]  }
  0x37   : > { %477 = vst [vmem:[%s7268_s27 + $0x148] sm:$0xff] %v476_v41   ;;  %481 = vst [vmem:[%s7268_s27 + $0x150] sm:$0xff] %v480_v42   ;;  %v496_v46 = vld [vmem:[%s7260_s26 + $0x270] sm:$0xff]   ;;  %v500_v47 = vld [vmem:[%s7260_s26 + $0x278] sm:$0xff]  }
  0x38   : > { %485 = vst [vmem:[%s7268_s27 + $0x158] sm:$0xff] %v484_v43   ;;  %489 = vst [vmem:[%s7268_s27 + $0x160] sm:$0xff] %v488_v44   ;;  %v504_v48 = vld [vmem:[%s7260_s26 + $0x300] sm:$0xff]   ;;  %v508_v49 = vld [vmem:[%s7260_s26 + $0x308] sm:$0xff]  }
  0x39   : > { %493 = vst [vmem:[%s7268_s27 + $0x168] sm:$0xff] %v492_v45   ;;  %497 = vst [vmem:[%s7268_s27 + $0x170] sm:$0xff] %v496_v46   ;;  %v512_v50 = vld [vmem:[%s7260_s26 + $0x310] sm:$0xff]   ;;  %v516_v51 = vld [vmem:[%s7260_s26 + $0x318] sm:$0xff]  }
  0x3a   : > { %501 = vst [vmem:[%s7268_s27 + $0x178] sm:$0xff] %v500_v47   ;;  %505 = vst [vmem:[%s7268_s27 + $0x180] sm:$0xff] %v504_v48   ;;  %v520_v52 = vld [vmem:[%s7260_s26 + $0x320] sm:$0xff]   ;;  %v524_v53 = vld [vmem:[%s7260_s26 + $0x328] sm:$0xff]  }
  0x3b   : > { %509 = vst [vmem:[%s7268_s27 + $0x188] sm:$0xff] %v508_v49   ;;  %513 = vst [vmem:[%s7268_s27 + $0x190] sm:$0xff] %v512_v50   ;;  %v528_v54 = vld [vmem:[%s7260_s26 + $0x330] sm:$0xff]   ;;  %v532_v55 = vld [vmem:[%s7260_s26 + $0x338] sm:$0xff]  }
  0x3c   : > { %517 = vst [vmem:[%s7268_s27 + $0x198] sm:$0xff] %v516_v51   ;;  %521 = vst [vmem:[%s7268_s27 + $0x1a0] sm:$0xff] %v520_v52   ;;  %v536_v56 = vld [vmem:[%s7260_s26 + $0x340] sm:$0xff]   ;;  %v540_v57 = vld [vmem:[%s7260_s26 + $0x348] sm:$0xff]  }
  0x3d   : > { %525 = vst [vmem:[%s7268_s27 + $0x1a8] sm:$0xff] %v524_v53   ;;  %529 = vst [vmem:[%s7268_s27 + $0x1b0] sm:$0xff] %v528_v54   ;;  %v544_v58 = vld [vmem:[%s7260_s26 + $0x350] sm:$0xff]   ;;  %v548_v59 = vld [vmem:[%s7260_s26 + $0x358] sm:$0xff]  }
  0x3e   : > { %533 = vst [vmem:[%s7268_s27 + $0x1b8] sm:$0xff] %v532_v55   ;;  %537 = vst [vmem:[%s7268_s27 + $0x1c0] sm:$0xff] %v536_v56   ;;  %v552_v60 = vld [vmem:[%s7260_s26 + $0x360] sm:$0xff]   ;;  %v556_v61 = vld [vmem:[%s7260_s26 + $0x368] sm:$0xff]  }
  0x3f   : > { %541 = vst [vmem:[%s7268_s27 + $0x1c8] sm:$0xff] %v540_v57   ;;  %545 = vst [vmem:[%s7268_s27 + $0x1d0] sm:$0xff] %v544_v58   ;;  %v560_v62 = vld [vmem:[%s7260_s26 + $0x370] sm:$0xff]   ;;  %v564_v63 = vld [vmem:[%s7260_s26 + $0x378] sm:$0xff]  }
  0x40   : > { %549 = vst [vmem:[%s7268_s27 + $0x1d8] sm:$0xff] %v548_v59   ;;  %553 = vst [vmem:[%s7268_s27 + $0x1e0] sm:$0xff] %v552_v60   ;;  %v568_v0 = vld [vmem:[%s7260_s26 + $0x400] sm:$0xff]   ;;  %v572_v1 = vld [vmem:[%s7260_s26 + $0x408] sm:$0xff]  }
  0x41   : > { %557 = vst [vmem:[%s7268_s27 + $0x1e8] sm:$0xff] %v556_v61   ;;  %561 = vst [vmem:[%s7268_s27 + $0x1f0] sm:$0xff] %v560_v62   ;;  %v576_v2 = vld [vmem:[%s7260_s26 + $0x410] sm:$0xff]   ;;  %v580_v3 = vld [vmem:[%s7260_s26 + $0x418] sm:$0xff]  }
  0x42   : > { %565 = vst [vmem:[%s7268_s27 + $0x1f8] sm:$0xff] %v564_v63   ;;  %569 = vst [vmem:[%s7268_s27 + $0x200] sm:$0xff] %v568_v0   ;;  %v584_v4 = vld [vmem:[%s7260_s26 + $0x420] sm:$0xff]   ;;  %v588_v5 = vld [vmem:[%s7260_s26 + $0x428] sm:$0xff]  }
  0x43   : > { %573 = vst [vmem:[%s7268_s27 + $0x208] sm:$0xff] %v572_v1   ;;  %577 = vst [vmem:[%s7268_s27 + $0x210] sm:$0xff] %v576_v2   ;;  %v592_v6 = vld [vmem:[%s7260_s26 + $0x430] sm:$0xff]   ;;  %v596_v7 = vld [vmem:[%s7260_s26 + $0x438] sm:$0xff]  }
  0x44   : > { %581 = vst [vmem:[%s7268_s27 + $0x218] sm:$0xff] %v580_v3   ;;  %585 = vst [vmem:[%s7268_s27 + $0x220] sm:$0xff] %v584_v4   ;;  %v600_v8 = vld [vmem:[%s7260_s26 + $0x440] sm:$0xff]   ;;  %v604_v9 = vld [vmem:[%s7260_s26 + $0x448] sm:$0xff]  }
  0x45   : > { %589 = vst [vmem:[%s7268_s27 + $0x228] sm:$0xff] %v588_v5   ;;  %593 = vst [vmem:[%s7268_s27 + $0x230] sm:$0xff] %v592_v6   ;;  %v608_v10 = vld [vmem:[%s7260_s26 + $0x450] sm:$0xff]   ;;  %v612_v11 = vld [vmem:[%s7260_s26 + $0x458] sm:$0xff]  }
  0x46   : > { %597 = vst [vmem:[%s7268_s27 + $0x238] sm:$0xff] %v596_v7   ;;  %601 = vst [vmem:[%s7268_s27 + $0x240] sm:$0xff] %v600_v8   ;;  %v616_v12 = vld [vmem:[%s7260_s26 + $0x460] sm:$0xff]   ;;  %v620_v13 = vld [vmem:[%s7260_s26 + $0x468] sm:$0xff]  }
  0x47   : > { %605 = vst [vmem:[%s7268_s27 + $0x248] sm:$0xff] %v604_v9   ;;  %609 = vst [vmem:[%s7268_s27 + $0x250] sm:$0xff] %v608_v10   ;;  %v624_v14 = vld [vmem:[%s7260_s26 + $0x470] sm:$0xff]   ;;  %v628_v15 = vld [vmem:[%s7260_s26 + $0x478] sm:$0xff]  }
  0x48   : > { %613 = vst [vmem:[%s7268_s27 + $0x258] sm:$0xff] %v612_v11   ;;  %617 = vst [vmem:[%s7268_s27 + $0x260] sm:$0xff] %v616_v12   ;;  %v632_v16 = vld [vmem:[%s7260_s26 + $0x500] sm:$0xff]   ;;  %v636_v17 = vld [vmem:[%s7260_s26 + $0x508] sm:$0xff]  }
  0x49   : > { %621 = vst [vmem:[%s7268_s27 + $0x268] sm:$0xff] %v620_v13   ;;  %625 = vst [vmem:[%s7268_s27 + $0x270] sm:$0xff] %v624_v14   ;;  %v640_v18 = vld [vmem:[%s7260_s26 + $0x510] sm:$0xff]   ;;  %v644_v19 = vld [vmem:[%s7260_s26 + $0x518] sm:$0xff]  }
  0x4a   : > { %629 = vst [vmem:[%s7268_s27 + $0x278] sm:$0xff] %v628_v15   ;;  %633 = vst [vmem:[%s7268_s27 + $0x280] sm:$0xff] %v632_v16   ;;  %v648_v20 = vld [vmem:[%s7260_s26 + $0x520] sm:$0xff]   ;;  %v652_v21 = vld [vmem:[%s7260_s26 + $0x528] sm:$0xff]  }
  0x4b   : > { %637 = vst [vmem:[%s7268_s27 + $0x288] sm:$0xff] %v636_v17   ;;  %641 = vst [vmem:[%s7268_s27 + $0x290] sm:$0xff] %v640_v18   ;;  %v656_v22 = vld [vmem:[%s7260_s26 + $0x530] sm:$0xff]   ;;  %v660_v23 = vld [vmem:[%s7260_s26 + $0x538] sm:$0xff]  }
  0x4c   : > { %645 = vst [vmem:[%s7268_s27 + $0x298] sm:$0xff] %v644_v19   ;;  %649 = vst [vmem:[%s7268_s27 + $0x2a0] sm:$0xff] %v648_v20   ;;  %v664_v24 = vld [vmem:[%s7260_s26 + $0x540] sm:$0xff]   ;;  %v668_v25 = vld [vmem:[%s7260_s26 + $0x548] sm:$0xff]  }
  0x4d   : > { %653 = vst [vmem:[%s7268_s27 + $0x2a8] sm:$0xff] %v652_v21   ;;  %657 = vst [vmem:[%s7268_s27 + $0x2b0] sm:$0xff] %v656_v22   ;;  %v672_v26 = vld [vmem:[%s7260_s26 + $0x550] sm:$0xff]   ;;  %v676_v27 = vld [vmem:[%s7260_s26 + $0x558] sm:$0xff]  }
  0x4e   : > { %661 = vst [vmem:[%s7268_s27 + $0x2b8] sm:$0xff] %v660_v23   ;;  %665 = vst [vmem:[%s7268_s27 + $0x2c0] sm:$0xff] %v664_v24   ;;  %v680_v28 = vld [vmem:[%s7260_s26 + $0x560] sm:$0xff]   ;;  %v684_v29 = vld [vmem:[%s7260_s26 + $0x568] sm:$0xff]  }
  0x4f   : > { %669 = vst [vmem:[%s7268_s27 + $0x2c8] sm:$0xff] %v668_v25   ;;  %673 = vst [vmem:[%s7268_s27 + $0x2d0] sm:$0xff] %v672_v26   ;;  %v688_v30 = vld [vmem:[%s7260_s26 + $0x570] sm:$0xff]   ;;  %v692_v31 = vld [vmem:[%s7260_s26 + $0x578] sm:$0xff]  }
  0x50   : > { %677 = vst [vmem:[%s7268_s27 + $0x2d8] sm:$0xff] %v676_v27   ;;  %681 = vst [vmem:[%s7268_s27 + $0x2e0] sm:$0xff] %v680_v28   ;;  %v696_v32 = vld [vmem:[%s7260_s26 + $0x600] sm:$0xff]   ;;  %v700_v33 = vld [vmem:[%s7260_s26 + $0x608] sm:$0xff]  }
  0x51   : > { %685 = vst [vmem:[%s7268_s27 + $0x2e8] sm:$0xff] %v684_v29   ;;  %689 = vst [vmem:[%s7268_s27 + $0x2f0] sm:$0xff] %v688_v30   ;;  %v704_v34 = vld [vmem:[%s7260_s26 + $0x610] sm:$0xff]   ;;  %v708_v35 = vld [vmem:[%s7260_s26 + $0x618] sm:$0xff]  }
  0x52   : > { %693 = vst [vmem:[%s7268_s27 + $0x2f8] sm:$0xff] %v692_v31   ;;  %697 = vst [vmem:[%s7268_s27 + $0x300] sm:$0xff] %v696_v32   ;;  %v712_v36 = vld [vmem:[%s7260_s26 + $0x620] sm:$0xff]   ;;  %v716_v37 = vld [vmem:[%s7260_s26 + $0x628] sm:$0xff]  }
  0x53   : > { %701 = vst [vmem:[%s7268_s27 + $0x308] sm:$0xff] %v700_v33   ;;  %705 = vst [vmem:[%s7268_s27 + $0x310] sm:$0xff] %v704_v34   ;;  %v720_v38 = vld [vmem:[%s7260_s26 + $0x630] sm:$0xff]   ;;  %v724_v39 = vld [vmem:[%s7260_s26 + $0x638] sm:$0xff]  }
  0x54   : > { %709 = vst [vmem:[%s7268_s27 + $0x318] sm:$0xff] %v708_v35   ;;  %713 = vst [vmem:[%s7268_s27 + $0x320] sm:$0xff] %v712_v36   ;;  %v728_v40 = vld [vmem:[%s7260_s26 + $0x640] sm:$0xff]   ;;  %v732_v41 = vld [vmem:[%s7260_s26 + $0x648] sm:$0xff]  }
  0x55   : > { %717 = vst [vmem:[%s7268_s27 + $0x328] sm:$0xff] %v716_v37   ;;  %721 = vst [vmem:[%s7268_s27 + $0x330] sm:$0xff] %v720_v38   ;;  %v736_v42 = vld [vmem:[%s7260_s26 + $0x650] sm:$0xff]   ;;  %v740_v43 = vld [vmem:[%s7260_s26 + $0x658] sm:$0xff]  }
  0x56   : > { %725 = vst [vmem:[%s7268_s27 + $0x338] sm:$0xff] %v724_v39   ;;  %729 = vst [vmem:[%s7268_s27 + $0x340] sm:$0xff] %v728_v40   ;;  %v744_v44 = vld [vmem:[%s7260_s26 + $0x660] sm:$0xff]   ;;  %v748_v45 = vld [vmem:[%s7260_s26 + $0x668] sm:$0xff]  }
  0x57   : > { %733 = vst [vmem:[%s7268_s27 + $0x348] sm:$0xff] %v732_v41   ;;  %737 = vst [vmem:[%s7268_s27 + $0x350] sm:$0xff] %v736_v42   ;;  %v752_v46 = vld [vmem:[%s7260_s26 + $0x670] sm:$0xff]   ;;  %v756_v47 = vld [vmem:[%s7260_s26 + $0x678] sm:$0xff]  }
  0x58   : > { %741 = vst [vmem:[%s7268_s27 + $0x358] sm:$0xff] %v740_v43   ;;  %745 = vst [vmem:[%s7268_s27 + $0x360] sm:$0xff] %v744_v44   ;;  %v760_v48 = vld [vmem:[%s7260_s26 + $0x700] sm:$0xff]   ;;  %v764_v49 = vld [vmem:[%s7260_s26 + $0x708] sm:$0xff]  }
  0x59   : > { %749 = vst [vmem:[%s7268_s27 + $0x368] sm:$0xff] %v748_v45   ;;  %753 = vst [vmem:[%s7268_s27 + $0x370] sm:$0xff] %v752_v46   ;;  %v768_v50 = vld [vmem:[%s7260_s26 + $0x710] sm:$0xff]   ;;  %v772_v51 = vld [vmem:[%s7260_s26 + $0x718] sm:$0xff]  }
  0x5a   : > { %757 = vst [vmem:[%s7268_s27 + $0x378] sm:$0xff] %v756_v47   ;;  %761 = vst [vmem:[%s7268_s27 + $0x380] sm:$0xff] %v760_v48   ;;  %v776_v52 = vld [vmem:[%s7260_s26 + $0x720] sm:$0xff]   ;;  %v780_v53 = vld [vmem:[%s7260_s26 + $0x728] sm:$0xff]  }
  0x5b   : > { %765 = vst [vmem:[%s7268_s27 + $0x388] sm:$0xff] %v764_v49   ;;  %769 = vst [vmem:[%s7268_s27 + $0x390] sm:$0xff] %v768_v50   ;;  %v784_v54 = vld [vmem:[%s7260_s26 + $0x730] sm:$0xff]   ;;  %v788_v55 = vld [vmem:[%s7260_s26 + $0x738] sm:$0xff]  }
  0x5c   : > { %773 = vst [vmem:[%s7268_s27 + $0x398] sm:$0xff] %v772_v51   ;;  %777 = vst [vmem:[%s7268_s27 + $0x3a0] sm:$0xff] %v776_v52   ;;  %v792_v56 = vld [vmem:[%s7260_s26 + $0x740] sm:$0xff]   ;;  %v796_v57 = vld [vmem:[%s7260_s26 + $0x748] sm:$0xff]  }
  0x5d   : > { %781 = vst [vmem:[%s7268_s27 + $0x3a8] sm:$0xff] %v780_v53   ;;  %785 = vst [vmem:[%s7268_s27 + $0x3b0] sm:$0xff] %v784_v54   ;;  %v800_v58 = vld [vmem:[%s7260_s26 + $0x750] sm:$0xff]   ;;  %v804_v59 = vld [vmem:[%s7260_s26 + $0x758] sm:$0xff]  }
  0x5e   : > { %789 = vst [vmem:[%s7268_s27 + $0x3b8] sm:$0xff] %v788_v55   ;;  %793 = vst [vmem:[%s7268_s27 + $0x3c0] sm:$0xff] %v792_v56   ;;  %v808_v60 = vld [vmem:[%s7260_s26 + $0x760] sm:$0xff]   ;;  %v812_v61 = vld [vmem:[%s7260_s26 + $0x768] sm:$0xff]  }
  0x5f   : > { %797 = vst [vmem:[%s7268_s27 + $0x3c8] sm:$0xff] %v796_v57   ;;  %801 = vst [vmem:[%s7268_s27 + $0x3d0] sm:$0xff] %v800_v58   ;;  %v816_v62 = vld [vmem:[%s7260_s26 + $0x770] sm:$0xff]   ;;  %v820_v63 = vld [vmem:[%s7260_s26 + $0x778] sm:$0xff]  }
  0x60   : > { %805 = vst [vmem:[%s7268_s27 + $0x3d8] sm:$0xff] %v804_v59   ;;  %809 = vst [vmem:[%s7268_s27 + $0x3e0] sm:$0xff] %v808_v60   ;;  %v824_v0 = vld [vmem:[%s7260_s26 + $0x800] sm:$0xff]   ;;  %v828_v1 = vld [vmem:[%s7260_s26 + $0x808] sm:$0xff]  }
  0x61   : > { %813 = vst [vmem:[%s7268_s27 + $0x3e8] sm:$0xff] %v812_v61   ;;  %817 = vst [vmem:[%s7268_s27 + $0x3f0] sm:$0xff] %v816_v62   ;;  %v832_v2 = vld [vmem:[%s7260_s26 + $0x810] sm:$0xff]   ;;  %v836_v3 = vld [vmem:[%s7260_s26 + $0x818] sm:$0xff]  }
  0x62   : > { %821 = vst [vmem:[%s7268_s27 + $0x3f8] sm:$0xff] %v820_v63   ;;  %825 = vst [vmem:[%s7268_s27 + $0x400] sm:$0xff] %v824_v0   ;;  %v840_v4 = vld [vmem:[%s7260_s26 + $0x820] sm:$0xff]   ;;  %v844_v5 = vld [vmem:[%s7260_s26 + $0x828] sm:$0xff]  }
  0x63   : > { %829 = vst [vmem:[%s7268_s27 + $0x408] sm:$0xff] %v828_v1   ;;  %833 = vst [vmem:[%s7268_s27 + $0x410] sm:$0xff] %v832_v2   ;;  %v848_v6 = vld [vmem:[%s7260_s26 + $0x830] sm:$0xff]   ;;  %v852_v7 = vld [vmem:[%s7260_s26 + $0x838] sm:$0xff]  }
  0x64   : > { %837 = vst [vmem:[%s7268_s27 + $0x418] sm:$0xff] %v836_v3   ;;  %841 = vst [vmem:[%s7268_s27 + $0x420] sm:$0xff] %v840_v4   ;;  %v856_v8 = vld [vmem:[%s7260_s26 + $0x840] sm:$0xff]   ;;  %v860_v9 = vld [vmem:[%s7260_s26 + $0x848] sm:$0xff]  }
  0x65   : > { %845 = vst [vmem:[%s7268_s27 + $0x428] sm:$0xff] %v844_v5   ;;  %849 = vst [vmem:[%s7268_s27 + $0x430] sm:$0xff] %v848_v6   ;;  %v864_v10 = vld [vmem:[%s7260_s26 + $0x850] sm:$0xff]   ;;  %v868_v11 = vld [vmem:[%s7260_s26 + $0x858] sm:$0xff]  }
  0x66   : > { %853 = vst [vmem:[%s7268_s27 + $0x438] sm:$0xff] %v852_v7   ;;  %857 = vst [vmem:[%s7268_s27 + $0x440] sm:$0xff] %v856_v8   ;;  %v872_v12 = vld [vmem:[%s7260_s26 + $0x860] sm:$0xff]   ;;  %v876_v13 = vld [vmem:[%s7260_s26 + $0x868] sm:$0xff]  }
  0x67   : > { %861 = vst [vmem:[%s7268_s27 + $0x448] sm:$0xff] %v860_v9   ;;  %865 = vst [vmem:[%s7268_s27 + $0x450] sm:$0xff] %v864_v10   ;;  %v880_v14 = vld [vmem:[%s7260_s26 + $0x870] sm:$0xff]   ;;  %v884_v15 = vld [vmem:[%s7260_s26 + $0x878] sm:$0xff]  }
  0x68   : > { %869 = vst [vmem:[%s7268_s27 + $0x458] sm:$0xff] %v868_v11   ;;  %873 = vst [vmem:[%s7268_s27 + $0x460] sm:$0xff] %v872_v12  }
  0x69   : > { %877 = vst [vmem:[%s7268_s27 + $0x468] sm:$0xff] %v876_v13   ;;  %881 = vst [vmem:[%s7268_s27 + $0x470] sm:$0xff] %v880_v14  }
  0x6a   : > { %885 = vst [vmem:[%s7268_s27 + $0x478] sm:$0xff] %v884_v15  }
  0x6b PF: > { %p5443_p10 = scmp.ge.s32.totalorder %s7146_s12, 1  ;;  %p1485_p11 = scmp.lt.s32.totalorder %s7146_s12, 3 }
  0x6d   : > { %p1486_p12 = pnand %p5443_p10, %p1485_p11 }
  0x6e   : > { %v5477_v16 = vld [vmem:[%s8317_s2 + $0x2] sm:$0x3] (!%p1486_p12)  ;;  %vm1731_vm0 = vcmask (!%p1486_p12), 1041408   ;;  %v7560_v17 = vld [vmem:[%s8317_s2 + $0x6] sm:$0x3] (!%p1486_p12)  ;;  %s7563_s17 = sand.u32 (!%p1486_p12), 1, %s7138_s10  }
  0x6f   : > { %1489 = sbr.rel (%p1486_p12) target bundleno = 1348 (0x544), region = 89  ;;  %6841 = vmatprep.subr.msk.bf16.mxu1 (!%p1486_p12), %vm1731_vm0, %v5477_v16  ;;  %6844 = vmatprep.subr.msk.bf16.mxu0 (!%p1486_p12), %vm1731_vm0, %v7560_v17  ;;  %v1733_v18 = vsel (!%p1486_p12), %vm1731_vm0, %v5477_v16, 0  ;;  %v7571_v19 = vsel (!%p1486_p12), %vm1731_vm0, %v7560_v17, 0  ;;  %v5704_v20 = vld [vmem:[%s8317_s2 + $0x8] sm:$0x3] (!%p1486_p12)  ;;  %vm1682_vm1 = vcmask (!%p1486_p12), 31744  }
  0x70   : > { %s6852_s21 = smul.u32 (!%p1486_p12), 1152, %s7563_s17  ;;  %6230 = vmatpush3.bf16.msra.mxu1 (!%p1486_p12), %v1733_v18  ;;  %6332 = vmatpush3.bf16.msra.mxu0 (!%p1486_p12), %v7571_v19  ;;  %v1566_v21 = vld [vmem:[%s8317_s2] sm:$0x3] (!%p1486_p12)  ;;  %v5769_v25 = vld [vmem:[%s8317_s2 + $0xa] sm:$0x3] (!%p1486_p12)  ;;  %v3070_v28 = vsel (!%p1486_p12), %vm1731_vm0, %v5704_v20, 0 }
  0x71   : > { %6846 = vmatprep.subr.msk.bf16.mxu0 (!%p1486_p12), %vm1731_vm0, %v5704_v20  ;;  %6842 = vmatprep.subr.msk.bf16.mxu1 (!%p1486_p12), %vm1731_vm0, %v1566_v21  ;;  %v2025_v26 = vsel (!%p1486_p12), %vm1731_vm0, %v1566_v21, 0  ;;  %v3429_v35 = vsel (!%p1486_p12), %vm1731_vm0, %v5769_v25, 0  ;;  %v7613_v36 = vld [vmem:[%s8317_s2 + $0xc] sm:$0x3] (!%p1486_p12)  ;;  %v5574_v61 = vld [vmem:[%s8317_s2 + $0x4] sm:$0x3] (!%p1486_p12) }
  0x72   : > { %s7583_s26 = scalar_lea.vmem (!%p1486_p12), [#allocation3], %s6852_s21  ;;  %v2352_v0 = vsel (!%p1486_p12), %vm1731_vm0, %v5574_v61, 0  ;;  %v3788_v7 = vsel (!%p1486_p12), %vm1731_vm0, %v7613_v36, 0  ;;  %v5899_v13 = vld [vmem:[%s8317_s2 + $0xe] sm:$0x3] (!%p1486_p12)  ;;  %vm4772_vm2 = vcmask (!%p1486_p12), 261120  }
  0x73   : > { %v6902_v22 = vld [vmem:[%s7583_s26 + $0x80] sm:$0xff] (!%p1486_p12)   ;;  %v6904_v24 = vld [vmem:[%s7583_s26 + $0x88] sm:$0xff] (!%p1486_p12)   ;;  %v6906_v29 = vld [vmem:[%s7583_s26 + $0x90] sm:$0xff] (!%p1486_p12)   ;;  %s8330_s1 = sld [smem:[#allocation11_spill]] (!%p1486_p12)  ;;  %s5444_s25 = sshll.u32 (!%p1486_p12), %s7563_s17, 8  ;;  %vm5117_vm3 = vcmask (!%p1486_p12), 523264  }
  0x74   : > { %v6903_v23 = vld [vmem:[%s7583_s26 + $0x180] sm:$0xff] (!%p1486_p12)   ;;  %6231 = vmatprep.mubr.msk.bf16.mxu1 (!%p1486_p12), %vm1682_vm1, %v6902_v22  ;;  %v6905_v27 = vld [vmem:[%s7583_s26 + $0x188] sm:$0xff] (!%p1486_p12)   ;;  %v6907_v31 = vld [vmem:[%s7583_s26 + $0x98] sm:$0xff] (!%p1486_p12)   ;;  %s8096_s27 = scalar_lea.vmem (!%p1486_p12), [#allocation4], %s5444_s25  ;;  %vm7150_vm4 = vmmov (!%p1486_p12), 0   ;;  %s6030_s24 = sshll.u32 (!%p1486_p12), %s7226_s13, 12 }
  0x75   : > { %6333 = vmatprep.mubr.msk.bf16.mxu0 (!%p1486_p12), %vm1682_vm1, %v6903_v23  ;;  %6232 = vmatmul.mubr.msk.bf16.vlgmr.msra.gmra.mrb[0].mxu1 (!%p1486_p12), %vm1682_vm1, %v6904_v24  ;;  %v6908_v30 = vld [vmem:[%s7583_s26 + $0x200] sm:$0xff] (!%p1486_p12)   ;;  %v6909_v33 = vld [vmem:[%s7583_s26 + $0x208] sm:$0xff] (!%p1486_p12)   ;;  %v6912_v34 = vld [vmem:[%s7583_s26 + $0x210] sm:$0xff] (!%p1486_p12)   ;;  %s5329_s25 = sshll.u32 (!%p1486_p12), %s8096_s27, 4  ;;  %s8235_s14 = scalar_lea.hbm (!%p1486_p12), %s8323_s8, %s6030_s24  ;;  %s8237_s25 = int_to_ptr.vmem [resolvable:$true] %s5329_s25 }
  0x76   : > { %6334 = vmatmul.mubr.msk.bf16.vlgmr.msra.gmra.mrb[0].mxu0 %vm1682_vm1, %v6905_v27  ;;  %6264 = vmatpush3.bf16.msra.mxu1 %v2025_v26  ;;  %v6910_v32 = vld [vmem:[%s7583_s26 + $0xa0] sm:$0xff]   ;;  %v6911_v37 = vld [vmem:[%s7583_s26 + $0xa8] sm:$0xff]   ;;  %v6914_v38 = vld [vmem:[%s7583_s26 + $0xb0] sm:$0xff]   ;;  %s7052_s16 = scalar_lea.vmem %s8237_s25, 4096  ;;  %s7151_s21 = smov [#allocation4]  }
  0x77   : > { %6235 = vmatprep.mubr.msk.bf16.mxu1 %vm1682_vm1, %v6906_v29  ;;  %6366 = vmatpush3.bf16.msra.mxu0 %v3070_v28  ;;  %v6913_v39 = vld [vmem:[%s7583_s26 + $0x218] sm:$0xff]   ;;  %v6916_v40 = vld [vmem:[%s7583_s26 + $0x220] sm:$0xff]   ;;  %v6917_v43 = vld [vmem:[%s7583_s26 + $0x228] sm:$0xff]   ;;  %p7053_p13 = scmp.ne.s32.totalorder %s8237_s25, %s7052_s16  ;;  %s7056_s22 = sshll.u32 %s7151_s21, 4  ;;  %s7057_s22 = int_to_ptr.vmem [resolvable:$false] %s7056_s22 }
  0x78   : > { %6847 = vmatprep.subr.msk.bf16.mxu0 %vm1731_vm0, %v5769_v25  ;;  %6367 = vmatprep.mubr.msk.bf16.mxu0 %vm1682_vm1, %v6908_v30  ;;  %v6915_v41 = vld [vmem:[%s7583_s26 + $0xb8] sm:$0xff]   ;;  %v6918_v42 = vld [vmem:[%s7583_s26 + $0xc0] sm:$0xff]   ;;  %v6920_v44 = vld [vmem:[%s7583_s26 + $0x230] sm:$0xff]   ;;  %p7059_p2 = scmp.lt.s32.totalorder %s8237_s25, %s7057_s22 }
  0x79   : > { %v6919_v45 = vld [vmem:[%s7583_s26 + $0xc8] sm:$0xff]   ;;  %v6922_v46 = vld [vmem:[%s7583_s26 + $0xd0] sm:$0xff]   ;;  %v6921_v47 = vld [vmem:[%s7583_s26 + $0x238] sm:$0xff]   ;;  %6843 = vmatprep.subr.msk.bf16.mxu1 %vm1731_vm0, %v5574_v61  ;;  %p7054_p0 = pnand %p7053_p13, %p7244_p6 }
  0x7a   : > { %v6924_v48 = vld [vmem:[%s7583_s26 + $0x240] sm:$0xff]   ;;  %v6923_v49 = vld [vmem:[%s7583_s26 + $0xd8] sm:$0xff]   ;;  %v6925_v51 = vld [vmem:[%s7583_s26 + $0x248] sm:$0xff]  }
  0x7b   : > { %v6926_v50 = vld [vmem:[%s7583_s26 + $0xe0] sm:$0xff]   ;;  %v6928_v52 = vld [vmem:[%s7583_s26 + $0x250] sm:$0xff]   ;;  %v6927_v53 = vld [vmem:[%s7583_s26 + $0xe8] sm:$0xff]   ;;  %p7055_p1 = pneg %p7054_p0 }
  0x7c   : > { %v6930_v54 = vld [vmem:[%s7583_s26 + $0xf0] sm:$0xff]   ;;  %v6929_v55 = vld [vmem:[%s7583_s26 + $0x258] sm:$0xff]   ;;  %v6932_v56 = vld [vmem:[%s7583_s26 + $0x260] sm:$0xff]  }
  0x7d   : > { %6236 = vmatmul.mubr.msk.bf16.gmra.mrb[4].mxu1 %vm1682_vm1, %v6907_v31  ;;  %v6931_v57 = vld [vmem:[%s7583_s26 + $0xf8] sm:$0xff]   ;;  %v6934_v58 = vld [vmem:[%s7583_s26] sm:$0xff]   ;;  %v6933_v59 = vld [vmem:[%s7583_s26 + $0x268] sm:$0xff]  }
  0x7e   : > { %6239 = vmatprep.mubr.msk.bf16.mxu1 %vm1682_vm1, %v6910_v32  ;;  %v6936_v60 = vld [vmem:[%s7583_s26 + $0x270] sm:$0xff]   ;;  %v6935_v62 = vld [vmem:[%s7583_s26 + $0x8] sm:$0xff]   ;;  %v6937_v1 = vld [vmem:[%s7583_s26 + $0x278] sm:$0xff]  }
  0x7f   : > { %v6938_v63 = vld [vmem:[%s7583_s26 + $0x10] sm:$0xff]   ;;  %v6940_v2 = vld [vmem:[%s7583_s26 + $0x280] sm:$0xff]   ;;  %v6939_v3 = vld [vmem:[%s7583_s26 + $0x18] sm:$0xff]  }
  0x80   : > { %v6942_v4 = vld [vmem:[%s7583_s26 + $0x20] sm:$0xff]   ;;  %v6941_v5 = vld [vmem:[%s7583_s26 + $0x288] sm:$0xff]   ;;  %v6944_v6 = vld [vmem:[%s7583_s26 + $0x290] sm:$0xff]  }
  0x81   : > { %v6943_v8 = vld [vmem:[%s7583_s26 + $0x28] sm:$0xff]   ;;  %v6946_v9 = vld [vmem:[%s7583_s26 + $0x30] sm:$0xff]   ;;  %v6945_v10 = vld [vmem:[%s7583_s26 + $0x298] sm:$0xff]  }
  0x82   : > { %6368 = vmatmul.mubr.msk.bf16.vlgmr.msra.gmra.mrb[0].mxu0 %vm1682_vm1, %v6909_v33  ;;  %v6948_v11 = vld [vmem:[%s7583_s26 + $0x2a0] sm:$0xff]   ;;  %v6947_v12 = vld [vmem:[%s7583_s26 + $0x38] sm:$0xff]   ;;  %v6949_v15 = vld [vmem:[%s7583_s26 + $0x2a8] sm:$0xff]  }
  0x83   : > { %6371 = vmatprep.mubr.msk.bf16.mxu0 %vm1682_vm1, %v6912_v34  ;;  %6400 = vmatpush3.bf16.msra.mxu0 %v3429_v35  ;;  %v6950_v14 = vld [vmem:[%s7583_s26 + $0x40] sm:$0xff]   ;;  %v6952_v16 = vld [vmem:[%s7583_s26 + $0x2b0] sm:$0xff]   ;;  %v6953_v20 = vld [vmem:[%s7583_s26 + $0x2b8] sm:$0xff]  }
  0x84   : > { %6848 = vmatprep.subr.msk.bf16.mxu0 %vm1731_vm0, %v7613_v36  ;;  %v6954_v18 = vld [vmem:[%s7583_s26 + $0x50] sm:$0xff]   ;;  %v6956_v21 = vld [vmem:[%s7583_s26 + $0x2c0] sm:$0xff]   ;;  %v6955_v22 = vld [vmem:[%s7583_s26 + $0x58] sm:$0xff]  }
  0x85   : > { %6240 = vmatmul.mubr.msk.bf16.gmra.mrb[8].mxu1 %vm1682_vm1, %v6911_v37  ;;  %v6958_v23 = vld [vmem:[%s7583_s26 + $0x60] sm:$0xff]   ;;  %v6957_v24 = vld [vmem:[%s7583_s26 + $0x2c8] sm:$0xff]   ;;  %v6960_v25 = vld [vmem:[%s7583_s26 + $0x2d0] sm:$0xff]  }
  0x86   : > { %6243 = vmatprep.mubr.msk.bf16.mxu1 %vm1682_vm1, %v6914_v38  ;;  %v6959_v26 = vld [vmem:[%s7583_s26 + $0x68] sm:$0xff]   ;;  %v6962_v27 = vld [vmem:[%s7583_s26 + $0x70] sm:$0xff]   ;;  %v6961_v28 = vld [vmem:[%s7583_s26 + $0x2d8] sm:$0xff]  }
  0x87   : > { %v6964_v29 = vld [vmem:[%s7583_s26 + $0x2e0] sm:$0xff]   ;;  %v6963_v30 = vld [vmem:[%s7583_s26 + $0x78] sm:$0xff]   ;;  %v6965_v32 = vld [vmem:[%s7583_s26 + $0x2e8] sm:$0xff]  }
  0x88   : > { %v6966_v31 = vld [vmem:[%s7583_s26 + $0x100] sm:$0xff]   ;;  %v6967_v33 = vld [vmem:[%s7583_s26 + $0x108] sm:$0xff]   ;;  %v6968_v34 = vld [vmem:[%s7583_s26 + $0x2f0] sm:$0xff]  }
  0x89   : > { %v6970_v35 = vld [vmem:[%s7583_s26 + $0x110] sm:$0xff]   ;;  %v6969_v36 = vld [vmem:[%s7583_s26 + $0x2f8] sm:$0xff]   ;;  %v6972_v37 = vld [vmem:[%s7583_s26 + $0x300] sm:$0xff]  }
  0x8a   : > { %6372 = vmatmul.mubr.msk.bf16.gmra.mrb[4].mxu0 %vm1682_vm1, %v6913_v39  ;;  %v6971_v38 = vld [vmem:[%s7583_s26 + $0x118] sm:$0xff]   ;;  %v6974_v39 = vld [vmem:[%s7583_s26 + $0x120] sm:$0xff]  }
  0x8b   : > { %6375 = vmatprep.mubr.msk.bf16.mxu0 %vm1682_vm1, %v6916_v40  ;;  %v4147_v40 = vsel %vm1731_vm0, %v5899_v13, 0  ;;  %v6993_v61 = vld [vmem:[%s7583_s26 + $0x358] sm:$0xff]  }
  0x8d   : > { %6244 = vmatmul.mubr.msk.bf16.gmra.mrb[12].mxu1 %vm1682_vm1, %v6915_v41  ;;  %v6973_v41 = vld [vmem:[%s7583_s26 + $0x308] sm:$0xff]  }
  0x8e   : > { %6247 = vmatprep.mubr.msk.bf16.mxu1 %vm1682_vm1, %v6918_v42  ;;  %v6976_v42 = vld [vmem:[%s7583_s26 + $0x310] sm:$0xff]  }
  0x92   : > { %6376 = vmatmul.mubr.msk.bf16.gmra.mrb[8].mxu0 %vm1682_vm1, %v6917_v43  ;;  %v6975_v43 = vld [vmem:[%s7583_s26 + $0x128] sm:$0xff]  }
  0x93   : > { %6379 = vmatprep.mubr.msk.bf16.mxu0 %vm1682_vm1, %v6920_v44  ;;  %v6978_v44 = vld [vmem:[%s7583_s26 + $0x130] sm:$0xff]  }
  0x95   : > { %6248 = vmatmul.mubr.msk.bf16.gmra.mrb[16].mxu1 %vm1682_vm1, %v6919_v45  ;;  %v6977_v45 = vld [vmem:[%s7583_s26 + $0x318] sm:$0xff]  }
  0x96   : > { %6251 = vmatprep.mubr.msk.bf16.mxu1 %vm1682_vm1, %v6922_v46  ;;  %v6980_v46 = vld [vmem:[%s7583_s26 + $0x320] sm:$0xff]  }
  0x9a   : > { %6380 = vmatmul.mubr.msk.bf16.gmra.mrb[12].mxu0 %vm1682_vm1, %v6921_v47  ;;  %v6979_v47 = vld [vmem:[%s7583_s26 + $0x138] sm:$0xff]  }
  0x9b   : > { %6383 = vmatprep.mubr.msk.bf16.mxu0 %vm1682_vm1, %v6924_v48  ;;  %v6982_v48 = vld [vmem:[%s7583_s26 + $0x140] sm:$0xff]  }
  0x9d   : > { %6252 = vmatmul.mubr.msk.bf16.gmra.mrb[20].mxu1 %vm1682_vm1, %v6923_v49  ;;  %v6981_v49 = vld [vmem:[%s7583_s26 + $0x328] sm:$0xff]  }
  0x9e   : > { %6255 = vmatprep.mubr.msk.bf16.mxu1 %vm1682_vm1, %v6926_v50  ;;  %v6984_v50 = vld [vmem:[%s7583_s26 + $0x330] sm:$0xff]  }
  0xa2   : > { %6384 = vmatmul.mubr.msk.bf16.gmra.mrb[16].mxu0 %vm1682_vm1, %v6925_v51  ;;  %v6983_v51 = vld [vmem:[%s7583_s26 + $0x148] sm:$0xff]  }
  0xa3   : > { %6387 = vmatprep.mubr.msk.bf16.mxu0 %vm1682_vm1, %v6928_v52  ;;  %v6986_v52 = vld [vmem:[%s7583_s26 + $0x150] sm:$0xff]  }
  0xa5   : > { %6256 = vmatmul.mubr.msk.bf16.gmra.mrb[24].mxu1 %vm1682_vm1, %v6927_v53  ;;  %v6985_v53 = vld [vmem:[%s7583_s26 + $0x338] sm:$0xff]  }
  0xa6   : > { %6259 = vmatprep.mubr.msk.bf16.mxu1 %vm1682_vm1, %v6930_v54  ;;  %v6988_v54 = vld [vmem:[%s7583_s26 + $0x340] sm:$0xff]  }
  0xaa   : > { %6388 = vmatmul.mubr.msk.bf16.gmra.mrb[20].mxu0 %vm1682_vm1, %v6929_v55  ;;  %v6987_v55 = vld [vmem:[%s7583_s26 + $0x158] sm:$0xff]  }
  0xab   : > { %6391 = vmatprep.mubr.msk.bf16.mxu0 %vm1682_vm1, %v6932_v56  ;;  %v6990_v56 = vld [vmem:[%s7583_s26 + $0x160] sm:$0xff]  }
  0xad   : > { %6260 = vmatmul.mubr.msk.bf16.gmra.mrb[28].mxu1 %vm1682_vm1, %v6931_v57  ;;  %v6989_v57 = vld [vmem:[%s7583_s26 + $0x348] sm:$0xff]  }
  0xae   : > { %6265 = vmatprep.mubr.msk.bf16.mxu1 %vm1682_vm1, %v6934_v58  ;;  %v6992_v58 = vld [vmem:[%s7583_s26 + $0x350] sm:$0xff]  }
  0xb2   : > { %6392 = vmatmul.mubr.msk.bf16.gmra.mrb[24].mxu0 %vm1682_vm1, %v6933_v59  ;;  %v6991_v59 = vld [vmem:[%s7583_s26 + $0x168] sm:$0xff]  }
  0xb3   : > { %6395 = vmatprep.mubr.msk.bf16.mxu0 %vm1682_vm1, %v6936_v60  ;;  %v6994_v60 = vld [vmem:[%s7583_s26 + $0x170] sm:$0xff]  }
  0xb5   : > { %6266 = vmatmul.mubr.msk.bf16.vlgmr.msra.gmra.mrb[0].mxu1 %vm1682_vm1, %v6935_v62  ;;  %v6996_v62 = vld [vmem:[%s7583_s26 + $0x360] sm:$0xff]  }
  0xb6   : > { %6269 = vmatprep.mubr.msk.bf16.mxu1 %vm1682_vm1, %v6938_v63  ;;  %6298 = vmatpush3.bf16.msra.mxu1 %v2352_v0  ;;  %v6995_v63 = vld [vmem:[%s7583_s26 + $0x178] sm:$0xff]   ;;  %v6998_v0 = vld [vmem:[%s7583_s26 + $0x190] sm:$0xff]  }
  0xb7   : > { %6845 = vmatprep.subr.msk.bf16.mxu1 %vm1731_vm0, %v7560_v17  ;;  %v6951_v17 = vld [vmem:[%s7583_s26 + $0x48] sm:$0xff]  }
  0xba   : > { %6396 = vmatmul.mubr.msk.bf16.gmra.mrb[28].mxu0 %vm1682_vm1, %v6937_v1  ;;  %v6997_v1 = vld [vmem:[%s7583_s26 + $0x368] sm:$0xff]  }
  0xbb   : > { %6401 = vmatprep.mubr.msk.bf16.mxu0 %vm1682_vm1, %v6940_v2  ;;  %v7000_v2 = vld [vmem:[%s7583_s26 + $0x370] sm:$0xff]  }
  0xbd   : > { %6270 = vmatmul.mubr.msk.bf16.gmra.mrb[4].mxu1 %vm1682_vm1, %v6939_v3  ;;  %v6999_v3 = vld [vmem:[%s7583_s26 + $0x198] sm:$0xff]  }
  0xbe   : > { %6273 = vmatprep.mubr.msk.bf16.mxu1 %vm1682_vm1, %v6942_v4  ;;  %v7002_v4 = vld [vmem:[%s7583_s26 + $0x1a0] sm:$0xff]  }
  0xc2   : > { %6402 = vmatmul.mubr.msk.bf16.vlgmr.msra.gmra.mrb[0].mxu0 %vm1682_vm1, %v6941_v5  ;;  %v7001_v5 = vld [vmem:[%s7583_s26 + $0x378] sm:$0xff]  }
  0xc3   : > { %6405 = vmatprep.mubr.msk.bf16.mxu0 %vm1682_vm1, %v6944_v6  ;;  %6434 = vmatpush3.bf16.msra.mxu0 %v3788_v7  ;;  %v7004_v6 = vld [vmem:[%s7583_s26 + $0x380] sm:$0xff]   ;;  %v7003_v7 = vld [vmem:[%s7583_s26 + $0x1a8] sm:$0xff]  }
  0xc4   : > { %6849 = vmatprep.subr.msk.bf16.mxu0 %vm1731_vm0, %v5899_v13  ;;  %v7010_v13 = vld [vmem:[%s7583_s26 + $0x1c0] sm:$0xff]  }
  0xc5   : > { %6274 = vmatmul.mubr.msk.bf16.gmra.mrb[8].mxu1 %vm1682_vm1, %v6943_v8  ;;  %v7006_v8 = vld [vmem:[%s7583_s26 + $0x1b0] sm:$0xff]  }
  0xc6   : > { %6277 = vmatprep.mubr.msk.bf16.mxu1 %vm1682_vm1, %v6946_v9  ;;  %v7005_v9 = vld [vmem:[%s7583_s26 + $0x388] sm:$0xff]  }
  0xca   : > { %6406 = vmatmul.mubr.msk.bf16.gmra.mrb[4].mxu0 %vm1682_vm1, %v6945_v10  ;;  %v7008_v10 = vld [vmem:[%s7583_s26 + $0x390] sm:$0xff]  }
  0xcb   : > { %6409 = vmatprep.mubr.msk.bf16.mxu0 %vm1682_vm1, %v6948_v11 }
  0xcd   : > { %6278 = vmatmul.mubr.msk.bf16.gmra.mrb[12].mxu1 %vm1682_vm1, %v6947_v12  ;;  %v7007_v12 = vld [vmem:[%s7583_s26 + $0x1b8] sm:$0xff]  }
  0xce   : > { %6281 = vmatprep.mubr.msk.bf16.mxu1 %vm1682_vm1, %v6950_v14  ;;  %v7009_v14 = vld [vmem:[%s7583_s26 + $0x398] sm:$0xff]  }
  0xd2   : > { %6410 = vmatmul.mubr.msk.bf16.gmra.mrb[8].mxu0 %vm1682_vm1, %v6949_v15  ;;  %v7012_v15 = vld [vmem:[%s7583_s26 + $0x3a0] sm:$0xff]  }
  0xd3   : > { %6413 = vmatprep.mubr.msk.bf16.mxu0 %vm1682_vm1, %v6952_v16  ;;  %v7011_v16 = vld [vmem:[%s7583_s26 + $0x1c8] sm:$0xff]  }
  0xd5   : > { %6282 = vmatmul.mubr.msk.bf16.gmra.mrb[16].mxu1 %vm1682_vm1, %v6951_v17  ;;  %v7014_v17 = vld [vmem:[%s7583_s26 + $0x1d0] sm:$0xff]  }
  0xd6   : > { %6285 = vmatprep.mubr.msk.bf16.mxu1 %vm1682_vm1, %v6954_v18  ;;  %v7013_v18 = vld [vmem:[%s7583_s26 + $0x3a8] sm:$0xff]  }
  0xda   : > { %6414 = vmatmul.mubr.msk.bf16.gmra.mrb[12].mxu0 %vm1682_vm1, %v6953_v20  ;;  %v7016_v20 = vld [vmem:[%s7583_s26 + $0x3b0] sm:$0xff]  }
  0xdb   : > { %6417 = vmatprep.mubr.msk.bf16.mxu0 %vm1682_vm1, %v6956_v21  ;;  %v7015_v21 = vld [vmem:[%s7583_s26 + $0x1d8] sm:$0xff]  }
  0xdd   : > { %6286 = vmatmul.mubr.msk.bf16.gmra.mrb[20].mxu1 %vm1682_vm1, %v6955_v22  ;;  %v7018_v22 = vld [vmem:[%s7583_s26 + $0x1e0] sm:$0xff]  }
  0xde   : > { %6289 = vmatprep.mubr.msk.bf16.mxu1 %vm1682_vm1, %v6958_v23  ;;  %v7017_v23 = vld [vmem:[%s7583_s26 + $0x3b8] sm:$0xff]  }
  0xe2   : > { %6418 = vmatmul.mubr.msk.bf16.gmra.mrb[16].mxu0 %vm1682_vm1, %v6957_v24  ;;  %v7020_v24 = vld [vmem:[%s7583_s26 + $0x3c0] sm:$0xff]  }
  0xe3   : > { %6421 = vmatprep.mubr.msk.bf16.mxu0 %vm1682_vm1, %v6960_v25  ;;  %v7019_v25 = vld [vmem:[%s7583_s26 + $0x1e8] sm:$0xff]  }
  0xe5   : > { %6290 = vmatmul.mubr.msk.bf16.gmra.mrb[24].mxu1 %vm1682_vm1, %v6959_v26  ;;  %v7022_v26 = vld [vmem:[%s7583_s26 + $0x1f0] sm:$0xff]  }
  0xe6   : > { %6293 = vmatprep.mubr.msk.bf16.mxu1 %vm1682_vm1, %v6962_v27  ;;  %v7021_v27 = vld [vmem:[%s7583_s26 + $0x3c8] sm:$0xff]  }
  0xea   : > { %6422 = vmatmul.mubr.msk.bf16.gmra.mrb[20].mxu0 %vm1682_vm1, %v6961_v28  ;;  %v7024_v28 = vld [vmem:[%s7583_s26 + $0x3d0] sm:$0xff]  }
  0xeb   : > { %6425 = vmatprep.mubr.msk.bf16.mxu0 %vm1682_vm1, %v6964_v29  ;;  %v7023_v29 = vld [vmem:[%s7583_s26 + $0x1f8] sm:$0xff]  }
  0xed   : > { %6294 = vmatmul.mubr.msk.bf16.gmra.mrb[28].mxu1 %vm1682_vm1, %v6963_v30  ;;  %v7025_v30 = vld [vmem:[%s7583_s26 + $0x3d8] sm:$0xff]  }
  0xee   : > { %6299 = vmatprep.mubr.msk.bf16.mxu1 %vm1682_vm1, %v6966_v31  ;;  %v7026_v31 = vld [vmem:[%s7583_s26 + $0x3e0] sm:$0xff]  }
  0xf2   : > { %6426 = vmatmul.mubr.msk.bf16.gmra.mrb[24].mxu0 %vm1682_vm1, %v6965_v32  ;;  %v7027_v32 = vld [vmem:[%s7583_s26 + $0x3e8] sm:$0xff]  }
  0xf3   : > { %6429 = vmatprep.mubr.msk.bf16.mxu0 %vm1682_vm1, %v6968_v34  ;;  %v7029_v34 = vld [vmem:[%s7583_s26 + $0x3f8] sm:$0xff]  }
  0xf5   : > { %6300 = vmatmul.mubr.msk.bf16.vlgmr.msra.gmra.mrb[0].mxu1 %vm1682_vm1, %v6967_v33  ;;  %v7028_v33 = vld [vmem:[%s7583_s26 + $0x3f0] sm:$0xff]  }
  0xf6   : > { %6303 = vmatprep.mubr.msk.bf16.mxu1 %vm1682_vm1, %v6970_v35  ;;  %6584 = vmatpush3.bf16.msra.mxu1 %v7571_v19  ;;  %v7764_v19 = vld [vmem:[%s8317_s2 + $0x10] sm:$0x3]  ;;  %v7030_v35 = vld [vmem:[%s7583_s26 + $0x400] sm:$0xff]  }
  0xf7   : > { %v4506_v11 = vsel %vm1731_vm0, %v7764_v19, 0 }
  0xfa   : > { %6430 = vmatmul.mubr.msk.bf16.gmra.mrb[28].mxu0 %vm1682_vm1, %v6969_v36  ;;  %v7031_v36 = vld [vmem:[%s7583_s26 + $0x408] sm:$0xff]  }
  0xfb   : > { %6435 = vmatprep.mubr.msk.bf16.mxu0 %vm1682_vm1, %v6972_v37  ;;  %v7032_v37 = vld [vmem:[%s7583_s26 + $0x410] sm:$0xff]  }
  0xfd   : > { %6304 = vmatmul.mubr.msk.bf16.gmra.mrb[4].mxu1 %vm1682_vm1, %v6971_v38  ;;  %v7033_v38 = vld [vmem:[%s7583_s26 + $0x418] sm:$0xff]  }
  0xfe   : > { %6307 = vmatprep.mubr.msk.bf16.mxu1 %vm1682_vm1, %v6974_v39  ;;  %v7034_v39 = vld [vmem:[%s7583_s26 + $0x420] sm:$0xff]  }
 0x102   : > { %6436 = vmatmul.mubr.msk.bf16.vlgmr.msra.gmra.mrb[0].mxu0 %vm1682_vm1, %v6973_v41  ;;  %v7036_v41 = vld [vmem:[%s7583_s26 + $0x430] sm:$0xff]  }
 0x103   : > { %6439 = vmatprep.mubr.msk.bf16.mxu0 %vm1682_vm1, %v6976_v42  ;;  %6468 = vmatpush3.bf16.msra.mxu0 %v4147_v40  ;;  %v7035_v40 = vld [vmem:[%s7583_s26 + $0x428] sm:$0xff]   ;;  %v7037_v42 = vld [vmem:[%s7583_s26 + $0x438] sm:$0xff]  }
 0x104   : > { %6850 = vmatprep.subr.msk.bf16.mxu0 %vm1731_vm0, %v7764_v19  ;;  %v7039_v19 = vld [vmem:[%s7583_s26 + $0x448] sm:$0xff]  }
 0x105   : > { %6308 = vmatmul.mubr.msk.bf16.gmra.mrb[8].mxu1 %vm1682_vm1, %v6975_v43  ;;  %v7038_v43 = vld [vmem:[%s7583_s26 + $0x440] sm:$0xff]  }
 0x106   : > { %6311 = vmatprep.mubr.msk.bf16.mxu1 %vm1682_vm1, %v6978_v44  ;;  %v7040_v44 = vld [vmem:[%s7583_s26 + $0x450] sm:$0xff]  }
 0x10a   : > { %6440 = vmatmul.mubr.msk.bf16.gmra.mrb[4].mxu0 %vm1682_vm1, %v6977_v45  ;;  %v7041_v45 = vld [vmem:[%s7583_s26 + $0x458] sm:$0xff]  }
 0x10b   : > { %6443 = vmatprep.mubr.msk.bf16.mxu0 %vm1682_vm1, %v6980_v46  ;;  %v7042_v46 = vld [vmem:[%s7583_s26 + $0x460] sm:$0xff]  }
 0x10d   : > { %6312 = vmatmul.mubr.msk.bf16.gmra.mrb[12].mxu1 %vm1682_vm1, %v6979_v47  ;;  %v7043_v47 = vld [vmem:[%s7583_s26 + $0x468] sm:$0xff]  }
 0x10e   : > { %6315 = vmatprep.mubr.msk.bf16.mxu1 %vm1682_vm1, %v6982_v48  ;;  %v7044_v48 = vld [vmem:[%s7583_s26 + $0x470] sm:$0xff]  }
 0x112   : > { %6444 = vmatmul.mubr.msk.bf16.gmra.mrb[8].mxu0 %vm1682_vm1, %v6981_v49  ;;  %v7045_v49 = vld [vmem:[%s7583_s26 + $0x478] sm:$0xff]   ;;  %s5312_s26 = scalar_lea.sflag [#allocation5], %s7563_s17 }
 0x113   : > { %6447 = vmatprep.mubr.msk.bf16.mxu0 %vm1682_vm1, %v6984_v50  ;;  %v7046_v50 = vld [vmem:[%s8319_s4] sm:$0xff]  }
 0x114   : > { %6535 = vmatprep.subr.bf16.mxu1 %v7046_v50 }
 0x115   : > { %6316 = vmatmul.mubr.msk.bf16.gmra.mrb[16].mxu1 %vm1682_vm1, %v6983_v51 }
 0x116   : > { %6319 = vmatprep.mubr.msk.bf16.mxu1 %vm1682_vm1, %v6986_v52 }
 0x11a   : > { %6448 = vmatmul.mubr.msk.bf16.gmra.mrb[12].mxu0 %vm1682_vm1, %v6985_v53 }
 0x11b   : > { %6451 = vmatprep.mubr.msk.bf16.mxu0 %vm1682_vm1, %v6988_v54 }
 0x11d   : > { %6320 = vmatmul.mubr.msk.bf16.gmra.mrb[20].mxu1 %vm1682_vm1, %v6987_v55  ;;  %v7047_v55 = vld [vmem:[%s8319_s4 + $0x8] sm:$0xff]  }
 0x11e   : > { %6323 = vmatprep.mubr.msk.bf16.mxu1 %vm1682_vm1, %v6990_v56 }
 0x122   : > { %6452 = vmatmul.mubr.msk.bf16.gmra.mrb[16].mxu0 %vm1682_vm1, %v6989_v57 }
 0x123   : > { %6455 = vmatprep.mubr.msk.bf16.mxu0 %vm1682_vm1, %v6992_v58 }
 0x125   : > { %6324 = vmatmul.mubr.msk.bf16.gmra.mrb[24].mxu1 %vm1682_vm1, %v6991_v59 }
 0x126   : > { %6327 = vmatprep.mubr.msk.bf16.mxu1 %vm1682_vm1, %v6994_v60 }
 0x12a   : > { %6456 = vmatmul.mubr.msk.bf16.gmra.mrb[20].mxu0 %vm1682_vm1, %v6993_v61 }
 0x12b   : > { %6459 = vmatprep.mubr.msk.bf16.mxu0 %vm1682_vm1, %v6996_v62 }
 0x12d   : > { %6328 = vmatmul.mubr.msk.bf16.gmra.mrb[28].mxu1 %vm1682_vm1, %v6995_v63 }
 0x12e   : > { %6337 = vmatprep.mubr.msk.bf16.mxu1 %vm1682_vm1, %v6998_v0 }
 0x132   : > { %6460 = vmatmul.mubr.msk.bf16.gmra.mrb[24].mxu0 %vm1682_vm1, %v6997_v1 }
 0x133   : > { %6463 = vmatprep.mubr.msk.bf16.mxu0 %vm1682_vm1, %v7000_v2 }
 0x135   : > { %6338 = vmatmul.mubr.msk.bf16.vlgmr.msra.gmra.mrb[4].mxu1 %vm1682_vm1, %v6999_v3 }
 0x136   : > { %6341 = vmatprep.mubr.msk.bf16.mxu1 %vm1682_vm1, %v7002_v4  ;;  %6536 = vmatpush3.bf16.msra.mxu1 %v7046_v50 }
 0x137   : > { %6537 = vmatprep.subr.bf16.mxu1 %v7047_v55 }
 0x13a   : > { %6464 = vmatmul.mubr.msk.bf16.gmra.mrb[28].mxu0 %vm1682_vm1, %v7001_v5  ;;  %6538 = vmatpush3.bf16.msra.mxu1 %v7047_v55 }
 0x13b   : > { %6469 = vmatprep.mubr.msk.bf16.mxu0 %vm1682_vm1, %v7004_v6 }
 0x13d   : > { %6342 = vmatmul.mubr.msk.bf16.gmra.mrb[8].mxu1 %vm1682_vm1, %v7003_v7 }
 0x13e   : > { %6345 = vmatprep.mubr.msk.bf16.mxu1 %vm1682_vm1, %v7006_v8 }
 0x142   : > { %6470 = vmatmul.mubr.msk.bf16.vlgmr.msra.gmra.mrb[0].mxu0 %vm1682_vm1, %v7005_v9 }
 0x143   : > { %6473 = vmatprep.mubr.msk.bf16.mxu0 %vm1682_vm1, %v7008_v10  ;;  %6502 = vmatpush3.bf16.msra.mxu0 %v4506_v11 }
 0x145   : > { %6346 = vmatmul.mubr.msk.bf16.gmra.mrb[12].mxu1 %vm1682_vm1, %v7007_v12 }
 0x146   : > { %6349 = vmatprep.mubr.msk.bf16.mxu1 %vm1682_vm1, %v7010_v13 }
 0x14a   : > { %6474 = vmatmul.mubr.msk.bf16.gmra.mrb[4].mxu0 %vm1682_vm1, %v7009_v14 }
 0x14b   : > { %6477 = vmatprep.mubr.msk.bf16.mxu0 %vm1682_vm1, %v7012_v15 }
 0x14d   : > { %6350 = vmatmul.mubr.msk.bf16.gmra.mrb[16].mxu1 %vm1682_vm1, %v7011_v16 }
 0x14e   : > { %6353 = vmatprep.mubr.msk.bf16.mxu1 %vm1682_vm1, %v7014_v17 }
 0x152   : > { %6478 = vmatmul.mubr.msk.bf16.gmra.mrb[8].mxu0 %vm1682_vm1, %v7013_v18 }
 0x153   : > { %6481 = vmatprep.mubr.msk.bf16.mxu0 %vm1682_vm1, %v7016_v20 }
 0x155   : > { %6354 = vmatmul.mubr.msk.bf16.gmra.mrb[20].mxu1 %vm1682_vm1, %v7015_v21 }
 0x156   : > { %6357 = vmatprep.mubr.msk.bf16.mxu1 %vm1682_vm1, %v7018_v22  ;;  %v7968_v22 = vld [vmem:[%s8318_s3] ss:$0 sm:$0xff] }
 0x15a   : > { %6482 = vmatmul.mubr.msk.bf16.gmra.mrb[12].mxu0 %vm1682_vm1, %v7017_v23 }
 0x15b   : > { %6485 = vmatprep.mubr.msk.bf16.mxu0 %vm1682_vm1, %v7020_v24 }
 0x15d   : > { %6358 = vmatmul.mubr.msk.bf16.gmra.mrb[24].mxu1 %vm1682_vm1, %v7019_v25 }
 0x15e   : > { %6361 = vmatprep.mubr.msk.bf16.mxu1 %vm1682_vm1, %v7022_v26 }
 0x162   : > { %6486 = vmatmul.mubr.msk.bf16.gmra.mrb[16].mxu0 %vm1682_vm1, %v7021_v27 }
 0x163   : > { %6489 = vmatprep.mubr.msk.bf16.mxu0 %vm1682_vm1, %v7024_v28 }
 0x165   : > { %6362 = vmatmul.mubr.msk.bf16.gmra.mrb[28].mxu1 %vm1682_vm1, %v7023_v29 }
 0x16a   : > { %6490 = vmatmul.mubr.msk.bf16.gmra.mrb[20].mxu0 %vm1682_vm1, %v7025_v30 }
 0x16b   : > { %6493 = vmatprep.mubr.msk.bf16.mxu0 %vm1682_vm1, %v7026_v31 }
 0x172   : > { %6494 = vmatmul.mubr.msk.bf16.gmra.mrb[24].mxu0 %vm1682_vm1, %v7027_v32 }
 0x173   : > { %6497 = vmatprep.mubr.msk.bf16.mxu0 %vm1682_vm1, %v7028_v33 }
 0x17a   : > { %6498 = vmatmul.mubr.msk.bf16.gmra.mrb[28].mxu0 %vm1682_vm1, %v7029_v34 }
 0x17b   : > { %6503 = vmatprep.mubr.msk.bf16.mxu0 %vm1682_vm1, %v7030_v35 }
 0x182   : > { %6504 = vmatmul.mubr.msk.bf16.vlgmr.msra.gmra.mrb[0].mxu0 %vm1682_vm1, %v7031_v36 }
 0x183   : > { %6507 = vmatprep.mubr.msk.bf16.mxu0 %vm1682_vm1, %v7032_v37 }
 0x18a   : > { %6508 = vmatmul.mubr.msk.bf16.gmra.mrb[4].mxu0 %vm1682_vm1, %v7033_v38 }
 0x18b   : > { %6511 = vmatprep.mubr.msk.bf16.mxu0 %vm1682_vm1, %v7034_v39 }
 0x192   : > { %6512 = vmatmul.mubr.msk.bf16.gmra.mrb[8].mxu0 %vm1682_vm1, %v7035_v40 }
 0x193   : > { %6515 = vmatprep.mubr.msk.bf16.mxu0 %vm1682_vm1, %v7036_v41 }
 0x19a   : > { %6516 = vmatmul.mubr.msk.bf16.gmra.mrb[12].mxu0 %vm1682_vm1, %v7037_v42 }
 0x19b   : > { %6519 = vmatprep.mubr.msk.bf16.mxu0 %vm1682_vm1, %v7038_v43 }
 0x1a2   : > { %6520 = vmatmul.mubr.msk.bf16.gmra.mrb[16].mxu0 %vm1682_vm1, %v7039_v19 }
 0x1a3   : > { %6523 = vmatprep.mubr.msk.bf16.mxu0 %vm1682_vm1, %v7040_v44 }
 0x1aa   : > { %6524 = vmatmul.mubr.msk.bf16.gmra.mrb[20].mxu0 %vm1682_vm1, %v7041_v45 }
 0x1ab   : > { %6527 = vmatprep.mubr.msk.bf16.mxu0 %vm1682_vm1, %v7042_v46 }
 0x1b2   : > { %6528 = vmatmul.mubr.msk.bf16.gmra.mrb[24].mxu0 %vm1682_vm1, %v7043_v47 }
 0x1b3   : > { %6531 = vmatprep.mubr.msk.bf16.mxu0 %vm1682_vm1, %v7044_v48 }
 0x1ba   : > { %6532 = vmatmul.mubr.msk.bf16.gmra.mrb[28].mxu0 %vm1682_vm1, %v7045_v49 }
 0x1c8   : > { %v6301_v51 = vpop.f32.mrb[0].mxu1 }
 0x1c9   : > { %v2388_v52 = vpop.f32.mrb[1].mxu1 }
 0x1ca   : > { %v6302_v53 = vpop.f32.mrb[2].mxu1 }
 0x1cb   : > { %v2391_v54 = vpop.f32.mrb[3].mxu1 }
 0x208   : > { %v6339_v56 = vpop.f32.mrb[4].mxu1 }
 0x209   : > { %v2763_v57 = vpop.f32.mrb[5].mxu1 }
 0x20a   : > { %v6340_v58 = vpop.f32.mrb[6].mxu1 }
 0x20b   : > { %v2766_v59 = vpop.f32.mrb[7].mxu1 }
 0x210   : > { %v7917_v60 = vpop.f32.mrb[8].mxu1 }
 0x211   : > { %v7919_v61 = vpop.f32.mrb[9].mxu1 }
 0x212   : > { %v7921_v62 = vpop.f32.mrb[10].mxu1 }
 0x213   : > { %v7923_v63 = vpop.f32.mrb[11].mxu1 }
 0x218   : > { %v7925_v0 = vpop.f32.mrb[12].mxu1 }
 0x219   : > { %v7927_v1 = vpop.f32.mrb[13].mxu1 }
 0x21a   : > { %v7929_v2 = vpop.f32.mrb[14].mxu1 }
 0x21b   : > { %v7931_v3 = vpop.f32.mrb[15].mxu1 }
 0x220   : > { %v7933_v4 = vpop.f32.mrb[16].mxu1 }
 0x221   : > { %v7935_v5 = vpop.f32.mrb[17].mxu1 }
 0x222   : > { %v7937_v6 = vpop.f32.mrb[18].mxu1 }
 0x223   : > { %v7939_v7 = vpop.f32.mrb[19].mxu1 }
 0x228   : > { %v7941_v8 = vpop.f32.mrb[20].mxu1 }
 0x229   : > { %v7943_v9 = vpop.f32.mrb[21].mxu1 }
 0x22a   : > { %v7945_v10 = vpop.f32.mrb[22].mxu1 }
 0x22b   : > { %v7947_v11 = vpop.f32.mrb[23].mxu1 }
 0x230   : > { %v7949_v12 = vpop.f32.mrb[24].mxu1 }
 0x231   : > { %v7951_v13 = vpop.f32.mrb[25].mxu1 }
 0x232   : > { %v7953_v14 = vpop.f32.mrb[26].mxu1 }
 0x233   : > { %v7955_v15 = vpop.f32.mrb[27].mxu1 }
 0x238   : > { %v7957_v16 = vpop.f32.mrb[28].mxu1 }
 0x239   : > { %v7959_v17 = vpop.f32.mrb[29].mxu1 }
 0x23a   : > { %v7961_v18 = vpop.f32.mrb[30].mxu1 }
 0x23b   : > { %v7963_v20 = vpop.f32.mrb[31].mxu1 }
 0x255   : > { %v6505_v21 = vpop.f32.mrb[0].mxu0 }
 0x256   : > { %v6585_v23 = vadd.f32 %v6505_v21, %v6301_v51  ;;  %v4542_v24 = vpop.f32.mrb[1].mxu0 }
 0x257   : > { %v6586_v25 = vadd.f32 %v4542_v24, %v2388_v52  ;;  %v6506_v26 = vpop.f32.mrb[2].mxu0 }
 0x258   : > { %v4710_v27 = vadd.f32 %v6585_v23, %v7968_v22  ;;  %v6587_v28 = vadd.f32 %v6506_v26, %v6302_v53  ;;  %v4545_v29 = vpop.f32.mrb[3].mxu0 }
 0x259   : > { %v4708_v30 = vadd.f32 %v6586_v25, %v7968_v22  ;;  %v6588_v31 = vadd.f32 %v4545_v29, %v2391_v54 }
 0x25a   : > { %v4742_v32 = vmax.f32 %v4710_v27, 0.0  ;;  %v4711_v33 = vadd.f32 %v6587_v28, %v7968_v22 }
 0x25b   : > { %v4740_v34 = vmax.f32 %v4708_v30, 0.0  ;;  %v4709_v35 = vadd.f32 %v6588_v31, %v7968_v22 }
 0x25c   : > { %4775 = vst.msk [vmem:[#allocation2 + $0x10] sm:$0xff] %vm4772_vm2, %v4742_v32  ;;  %v4743_v36 = vmax.f32 %v4711_v33, 0.0 }
 0x25d   : > { %4773 = vst.msk [vmem:[#allocation2] sm:$0xff] %vm4772_vm2, %v4740_v34  ;;  %v4741_v37 = vmax.f32 %v4709_v35, 0.0  ;;  %v6509_v38 = vpop.f32.mrb[4].mxu0 }
 0x25e   : > { %4776 = vst.msk [vmem:[#allocation2 + $0x18] sm:$0xff] %vm4772_vm2, %v4743_v36  ;;  %v6589_v39 = vadd.f32 %v6509_v38, %v6339_v56  ;;  %v4558_v40 = vpop.f32.mrb[5].mxu0 }
 0x25f   : > { %4774 = vst.msk [vmem:[#allocation2 + $0x8] sm:$0xff] %vm4772_vm2, %v4741_v37  ;;  %v6590_v41 = vadd.f32 %v4558_v40, %v2763_v57  ;;  %v6510_v42 = vpop.f32.mrb[6].mxu0 }
 0x260   : > { %v4714_v43 = vadd.f32 %v6589_v39, %v7968_v22  ;;  %v6591_v19 = vadd.f32 %v6510_v42, %v6340_v58  ;;  %v4561_v44 = vpop.f32.mrb[7].mxu0 }
 0x261   : > { %v4712_v45 = vadd.f32 %v6590_v41, %v7968_v22  ;;  %v6592_v46 = vadd.f32 %v4561_v44, %v2766_v59 }
 0x262   : > { %v4746_v47 = vmax.f32 %v4714_v43, 0.0  ;;  %v4715_v48 = vadd.f32 %v6591_v19, %v7968_v22 }
 0x263   : > { %v4744_v49 = vmax.f32 %v4712_v45, 0.0  ;;  %v4713_v50 = vadd.f32 %v6592_v46, %v7968_v22  ;;  %v4807_v24 = vld [vmem:[#allocation2 + $0x10] sm:$0xff] }
 0x264   : > { %4779 = vst.msk [vmem:[#allocation2 + $0x30] sm:$0xff] %vm4772_vm2, %v4746_v47  ;;  %v4747_v51 = vmax.f32 %v4715_v48, 0.0  ;;  %v4805_v57 = vld [vmem:[#allocation2] sm:$0xff] }
 0x265   : > { %4777 = vst.msk [vmem:[#allocation2 + $0x20] sm:$0xff] %vm4772_vm2, %v4744_v49  ;;  %v4745_v52 = vmax.f32 %v4713_v50, 0.0  ;;  %v6513_v53 = vpop.f32.mrb[8].mxu0  ;;  %v4808_v54 = vld [vmem:[#allocation2 + $0x18] sm:$0xff] }
 0x266   : > { %4780 = vst.msk [vmem:[#allocation2 + $0x38] sm:$0xff] %vm4772_vm2, %v4747_v51  ;;  %v6593_v55 = vadd.f32 %v6513_v53, %v7917_v60  ;;  %v4574_v56 = vpop.f32.mrb[9].mxu0  ;;  %v4806_v58 = vld [vmem:[#allocation2 + $0x8] sm:$0xff]  ;;  %v4838_v28 = vpack.c.bf16 %v4808_v54, %v4807_v24 }
 0x267   : > { %4778 = vst.msk [vmem:[#allocation2 + $0x28] sm:$0xff] %vm4772_vm2, %v4745_v52  ;;  %v6594_v59 = vadd.f32 %v4574_v56, %v7919_v61  ;;  %v6514_v21 = vpop.f32.mrb[10].mxu0  ;;  %v4837_v23 = vpack.c.bf16 %v4806_v58, %v4805_v57 }
 0x268   : > { %v4718_v25 = vadd.f32 %v6593_v55, %v7968_v22  ;;  %v6595_v26 = vadd.f32 %v6514_v21, %v7921_v62  ;;  %v4577_v27 = vpop.f32.mrb[11].mxu0 }
 0x269   : > { %v4716_v29 = vadd.f32 %v6594_v59, %v7968_v22  ;;  %v6596_v60 = vadd.f32 %v4577_v27, %v7923_v63  ;;  %6539 = vmatprep.mubr.msk.bf16.mxu1 %vm4772_vm2, %v4837_v23 }
 0x26a   : > { %v4750_v30 = vmax.f32 %v4718_v25, 0.0  ;;  %v4719_v31 = vadd.f32 %v6595_v26, %v7968_v22  ;;  %6540 = vmatmul.mubr.msk.bf16.vlgmr.msra.gmra.mrb[32].mxu1 %vm4772_vm2, %v4838_v28 }
 0x26b   : > { %v4748_v61 = vmax.f32 %v4716_v29, 0.0  ;;  %v4717_v32 = vadd.f32 %v6596_v60, %v7968_v22  ;;  %v4811_v42 = vld [vmem:[#allocation2 + $0x30] sm:$0xff] }
 0x26c   : > { %4783 = vst.msk [vmem:[#allocation2 + $0x50] sm:$0xff] %vm4772_vm2, %v4750_v30  ;;  %v4751_v33 = vmax.f32 %v4719_v31, 0.0  ;;  %v4809_v37 = vld [vmem:[#allocation2 + $0x20] sm:$0xff] }
 0x26d   : > { %4781 = vst.msk [vmem:[#allocation2 + $0x40] sm:$0xff] %vm4772_vm2, %v4748_v61  ;;  %v4749_v62 = vmax.f32 %v4717_v32, 0.0  ;;  %v6517_v34 = vpop.f32.mrb[12].mxu0  ;;  %v4812_v35 = vld [vmem:[#allocation2 + $0x38] sm:$0xff] }
 0x26e   : > { %4784 = vst.msk [vmem:[#allocation2 + $0x58] sm:$0xff] %vm4772_vm2, %v4751_v33  ;;  %v6597_v63 = vadd.f32 %v6517_v34, %v7925_v0  ;;  %v4590_v36 = vpop.f32.mrb[13].mxu0  ;;  %v4810_v38 = vld [vmem:[#allocation2 + $0x28] sm:$0xff]  ;;  %v4840_v45 = vpack.c.bf16 %v4812_v35, %v4811_v42 }
 0x26f   : > { %4782 = vst.msk [vmem:[#allocation2 + $0x48] sm:$0xff] %vm4772_vm2, %v4749_v62  ;;  %v6598_v39 = vadd.f32 %v4590_v36, %v7927_v1  ;;  %v6518_v40 = vpop.f32.mrb[14].mxu0  ;;  %v4839_v41 = vpack.c.bf16 %v4810_v38, %v4809_v37 }
 0x270   : > { %v4722_v43 = vadd.f32 %v6597_v63, %v7968_v22  ;;  %v6599_v19 = vadd.f32 %v6518_v40, %v7929_v2  ;;  %v4593_v44 = vpop.f32.mrb[15].mxu0 }
 0x271   : > { %v4720_v46 = vadd.f32 %v6598_v39, %v7968_v22  ;;  %v6600_v0 = vadd.f32 %v4593_v44, %v7931_v3  ;;  %6543 = vmatprep.mubr.msk.bf16.mxu1 %vm4772_vm2, %v4839_v41 }
 0x272   : > { %v4754_v47 = vmax.f32 %v4722_v43, 0.0  ;;  %v4723_v48 = vadd.f32 %v6599_v19, %v7968_v22  ;;  %6544 = vmatmul.mubr.msk.bf16.gmra.mrb[36].mxu1 %vm4772_vm2, %v4840_v45 }
 0x273   : > { %v4752_v1 = vmax.f32 %v4720_v46, 0.0  ;;  %v4721_v49 = vadd.f32 %v6600_v0, %v7968_v22  ;;  %v4815_v59 = vld [vmem:[#allocation2 + $0x50] sm:$0xff] }
 0x274   : > { %4787 = vst.msk [vmem:[#allocation2 + $0x70] sm:$0xff] %vm4772_vm2, %v4754_v47  ;;  %v4755_v50 = vmax.f32 %v4723_v48, 0.0  ;;  %v4813_v54 = vld [vmem:[#allocation2 + $0x40] sm:$0xff] }
 0x275   : > { %4785 = vst.msk [vmem:[#allocation2 + $0x60] sm:$0xff] %vm4772_vm2, %v4752_v1  ;;  %v4753_v2 = vmax.f32 %v4721_v49, 0.0  ;;  %v6521_v51 = vpop.f32.mrb[16].mxu0  ;;  %v4816_v52 = vld [vmem:[#allocation2 + $0x58] sm:$0xff] }
 0x276   : > { %4788 = vst.msk [vmem:[#allocation2 + $0x78] sm:$0xff] %vm4772_vm2, %v4755_v50  ;;  %v6601_v3 = vadd.f32 %v6521_v51, %v7933_v4  ;;  %v4606_v53 = vpop.f32.mrb[17].mxu0  ;;  %v4814_v55 = vld [vmem:[#allocation2 + $0x48] sm:$0xff]  ;;  %v4842_v25 = vpack.c.bf16 %v4816_v52, %v4815_v59 }
 0x277   : > { %4786 = vst.msk [vmem:[#allocation2 + $0x68] sm:$0xff] %vm4772_vm2, %v4753_v2  ;;  %v6602_v56 = vadd.f32 %v4606_v53, %v7935_v5  ;;  %v6522_v57 = vpop.f32.mrb[18].mxu0  ;;  %v4841_v58 = vpack.c.bf16 %v4814_v55, %v4813_v54 }
 0x278   : > { %v4726_v21 = vadd.f32 %v6601_v3, %v7968_v22  ;;  %v6603_v23 = vadd.f32 %v6522_v57, %v7937_v6  ;;  %v4609_v24 = vpop.f32.mrb[19].mxu0 }
 0x279   : > { %v4724_v26 = vadd.f32 %v6602_v56, %v7968_v22  ;;  %v6604_v4 = vadd.f32 %v4609_v24, %v7939_v7  ;;  %6547 = vmatprep.mubr.msk.bf16.mxu1 %vm4772_vm2, %v4841_v58 }
 0x27a   : > { %v4758_v27 = vmax.f32 %v4726_v21, 0.0  ;;  %v4727_v28 = vadd.f32 %v6603_v23, %v7968_v22  ;;  %6548 = vmatmul.mubr.msk.bf16.gmra.mrb[40].mxu1 %vm4772_vm2, %v4842_v25 }
 0x27b   : > { %v4756_v5 = vmax.f32 %v4724_v26, 0.0  ;;  %v4725_v29 = vadd.f32 %v6604_v4, %v7968_v22  ;;  %v4819_v63 = vld [vmem:[#allocation2 + $0x70] sm:$0xff] }
 0x27c   : > { %4791 = vst.msk [vmem:[#allocation2 + $0x90] sm:$0xff] %vm4772_vm2, %v4758_v27  ;;  %v4759_v60 = vmax.f32 %v4727_v28, 0.0  ;;  %v4817_v32 = vld [vmem:[#allocation2 + $0x60] sm:$0xff] }
 0x27d   : > { %4789 = vst.msk [vmem:[#allocation2 + $0x80] sm:$0xff] %vm4772_vm2, %v4756_v5  ;;  %v4757_v6 = vmax.f32 %v4725_v29, 0.0  ;;  %v6525_v30 = vpop.f32.mrb[20].mxu0  ;;  %v4820_v31 = vld [vmem:[#allocation2 + $0x78] sm:$0xff] }
 0x27e   : > { %4792 = vst.msk [vmem:[#allocation2 + $0x98] sm:$0xff] %vm4772_vm2, %v4759_v60  ;;  %v6605_v7 = vadd.f32 %v6525_v30, %v7941_v8  ;;  %v4622_v61 = vpop.f32.mrb[21].mxu0  ;;  %v4818_v33 = vld [vmem:[#allocation2 + $0x68] sm:$0xff]  ;;  %v4844_v39 = vpack.c.bf16 %v4820_v31, %v4819_v63 }
 0x27f   : > { %4790 = vst.msk [vmem:[#allocation2 + $0x88] sm:$0xff] %vm4772_vm2, %v4757_v6  ;;  %v6606_v62 = vadd.f32 %v4622_v61, %v7943_v9  ;;  %v6526_v34 = vpop.f32.mrb[22].mxu0  ;;  %v4843_v35 = vpack.c.bf16 %v4818_v33, %v4817_v32 }
 0x280   : > { %v4730_v36 = vadd.f32 %v6605_v7, %v7968_v22  ;;  %v6607_v37 = vadd.f32 %v6526_v34, %v7945_v10  ;;  %v4625_v38 = vpop.f32.mrb[23].mxu0 }
 0x281   : > { %v4728_v40 = vadd.f32 %v6606_v62, %v7968_v22  ;;  %v6608_v8 = vadd.f32 %v4625_v38, %v7947_v11  ;;  %6551 = vmatprep.mubr.msk.bf16.mxu1 %vm4772_vm2, %v4843_v35 }
 0x282   : > { %v4762_v41 = vmax.f32 %v4730_v36, 0.0  ;;  %v4731_v42 = vadd.f32 %v6607_v37, %v7968_v22  ;;  %6552 = vmatmul.mubr.msk.bf16.gmra.mrb[44].mxu1 %vm4772_vm2, %v4844_v39 }
 0x283   : > { %v4760_v9 = vmax.f32 %v4728_v40, 0.0  ;;  %v4729_v43 = vadd.f32 %v6608_v8, %v7968_v22  ;;  %v4823_v50 = vld [vmem:[#allocation2 + $0x90] sm:$0xff]  ;;  %v7148_v40 = vmov 1966171168  }
 0x284   : > { %4795 = vst.msk [vmem:[#allocation2 + $0xb0] sm:$0xff] %vm4772_vm2, %v4762_v41  ;;  %v4763_v19 = vmax.f32 %v4731_v42, 0.0  ;;  %v4821_v0 = vld [vmem:[#allocation2 + $0x80] sm:$0xff]  ;;  %v5177_v8 = vunpack.c.l.s4 %v7148_v40  ;;  %v5179_v41 = vlaneseq }
 0x285   : > { %4793 = vst.msk [vmem:[#allocation2 + $0xa0] sm:$0xff] %vm4772_vm2, %v4760_v9  ;;  %v4761_v10 = vmax.f32 %v4729_v43, 0.0  ;;  %v6529_v44 = vpop.f32.mrb[24].mxu0  ;;  %v4824_v45 = vld [vmem:[#allocation2 + $0x98] sm:$0xff] }
 0x286   : > { %4796 = vst.msk [vmem:[#allocation2 + $0xb8] sm:$0xff] %vm4772_vm2, %v4763_v19  ;;  %v6609_v11 = vadd.f32 %v6529_v44, %v7949_v12  ;;  %v4638_v46 = vpop.f32.mrb[25].mxu0  ;;  %v4822_v47 = vld [vmem:[#allocation2 + $0x88] sm:$0xff]  ;;  %v4846_v3 = vpack.c.bf16 %v4824_v45, %v4823_v50  ;;  %v5178_v42 = vunpack.c.0.s8 %v5177_v8  ;;  %v5180_v9 = vshrl.u32 %v5179_v41, 7 }
 0x287   : > { %4794 = vst.msk [vmem:[#allocation2 + $0xa8] sm:$0xff] %vm4772_vm2, %v4761_v10  ;;  %v6610_v48 = vadd.f32 %v4638_v46, %v7951_v13  ;;  %v6530_v1 = vpop.f32.mrb[26].mxu0  ;;  %v4845_v49 = vpack.c.bf16 %v4822_v47, %v4821_v0  ;;  %v8077_v43 = vld.sshfl [vmem:[%s8330_s1] sm:$0x11 pattern:$0x75316420] }
 0x288   : > { %v4734_v2 = vadd.f32 %v6609_v11, %v7968_v22  ;;  %v6611_v51 = vadd.f32 %v6530_v1, %v7953_v14  ;;  %v4641_v52 = vpop.f32.mrb[27].mxu0  ;;  %v5175_v19 = vcombine.high %v8077_v43, %v8077_v43  ;;  %v8081_v10 = vsub.s32 %v5178_v42, %v5180_v9  ;;  %v8089_v11 = vld [vmem:[%s8320_s5] ss:$0 sm:$0xff] }
 0x289   : > { %v4732_v53 = vadd.f32 %v6610_v48, %v7968_v22  ;;  %v6612_v12 = vadd.f32 %v4641_v52, %v7955_v15  ;;  %6555 = vmatprep.mubr.msk.bf16.mxu1 %vm4772_vm2, %v4845_v49 }
 0x28a   : > { %v4766_v54 = vmax.f32 %v4734_v2, 0.0  ;;  %v4735_v55 = vadd.f32 %v6611_v51, %v7968_v22  ;;  %6556 = vmatmul.mubr.msk.bf16.gmra.mrb[48].mxu1 %vm4772_vm2, %v4846_v3  ;;  %v5182_v44 = vrot.slane %v8077_v43, %v8081_v10  ;;  %v5189_v45 = vrot.slane %v5175_v19, %v8081_v10  ;;  %v7051_v43 = vld [vmem:[%s8321_s6 + $0x18] sm:$0xff]  }
 0x28b   : > { %v4764_v13 = vmax.f32 %v4732_v53, 0.0  ;;  %v4733_v56 = vadd.f32 %v6612_v12, %v7968_v22  ;;  %v4827_v27 = vld [vmem:[#allocation2 + $0xb0] sm:$0xff] }
 0x28c   : > { %4799 = vst.msk [vmem:[#allocation2 + $0xd0] sm:$0xff] %vm4772_vm2, %v4766_v54  ;;  %v4767_v57 = vmax.f32 %v4735_v55, 0.0  ;;  %v4825_v23 = vld [vmem:[#allocation2 + $0xa0] sm:$0xff] }
 0x28d   : > { %4797 = vst.msk [vmem:[#allocation2 + $0xc0] sm:$0xff] %vm4772_vm2, %v4764_v13  ;;  %v4765_v14 = vmax.f32 %v4733_v56, 0.0  ;;  %v6533_v58 = vpop.f32.mrb[28].mxu0  ;;  %v4828_v59 = vld [vmem:[#allocation2 + $0xb8] sm:$0xff] }
 0x28e   : > { %4800 = vst.msk [vmem:[#allocation2 + $0xd8] sm:$0xff] %vm4772_vm2, %v4767_v57  ;;  %v6613_v15 = vadd.f32 %v6533_v58, %v7957_v16  ;;  %v4654_v21 = vpop.f32.mrb[29].mxu0  ;;  %v4826_v24 = vld [vmem:[#allocation2 + $0xa8] sm:$0xff]  ;;  %v4848_v60 = vpack.c.bf16 %v4828_v59, %v4827_v27 }
 0x28f   : > { %4798 = vst.msk [vmem:[#allocation2 + $0xc8] sm:$0xff] %vm4772_vm2, %v4765_v14  ;;  %v6614_v25 = vadd.f32 %v4654_v21, %v7959_v17  ;;  %v6534_v26 = vpop.f32.mrb[30].mxu0  ;;  %v4847_v4 = vpack.c.bf16 %v4826_v24, %v4825_v23 }
 0x290   : > { %v4738_v28 = vadd.f32 %v6613_v15, %v7968_v22  ;;  %v6615_v5 = vadd.f32 %v6534_v26, %v7961_v18  ;;  %v4657_v29 = vpop.f32.mrb[31].mxu0 }
 0x291   : > { %v4736_v6 = vadd.f32 %v6614_v25, %v7968_v22  ;;  %v6616_v16 = vadd.f32 %v4657_v29, %v7963_v20  ;;  %6559 = vmatprep.mubr.msk.bf16.mxu1 %vm4772_vm2, %v4847_v4 }
 0x292   : > { %v4770_v30 = vmax.f32 %v4738_v28, 0.0  ;;  %v4739_v31 = vadd.f32 %v6615_v5, %v7968_v22  ;;  %6560 = vmatmul.mubr.msk.bf16.gmra.mrb[52].mxu1 %vm4772_vm2, %v4848_v60 }
 0x293   : > { %v4768_v17 = vmax.f32 %v4736_v6, 0.0  ;;  %v4737_v7 = vadd.f32 %v6616_v16, %v7968_v22  ;;  %v4831_v34 = vld [vmem:[#allocation2 + $0xd0] sm:$0xff] }
 0x294   : > { %4803 = vst.msk [vmem:[#allocation2 + $0xf0] sm:$0xff] %vm4772_vm2, %v4770_v30  ;;  %v4771_v61 = vmax.f32 %v4739_v31, 0.0  ;;  %v4829_v20 = vld [vmem:[#allocation2 + $0xc0] sm:$0xff] }
 0x295   : > { %4801 = vst.msk [vmem:[#allocation2 + $0xe0] sm:$0xff] %vm4772_vm2, %v4768_v17  ;;  %v4769_v18 = vmax.f32 %v4737_v7, 0.0  ;;  %v4832_v32 = vld [vmem:[#allocation2 + $0xd8] sm:$0xff] }
 0x296   : > { %4804 = vst.msk [vmem:[#allocation2 + $0xf8] sm:$0xff] %vm4772_vm2, %v4771_v61  ;;  %v4830_v33 = vld [vmem:[#allocation2 + $0xc8] sm:$0xff]  ;;  %v4850_v35 = vpack.c.bf16 %v4832_v32, %v4831_v34 }
 0x297   : > { %4802 = vst.msk [vmem:[#allocation2 + $0xe8] sm:$0xff] %vm4772_vm2, %v4769_v18  ;;  %v4849_v62 = vpack.c.bf16 %v4830_v33, %v4829_v20 }
 0x299   : > { %6563 = vmatprep.mubr.msk.bf16.mxu1 %vm4772_vm2, %v4849_v62 }
 0x29a   : > { %6564 = vmatmul.mubr.msk.bf16.gmra.mrb[56].mxu1 %vm4772_vm2, %v4850_v35 }
 0x29b   : > { %v4835_v38 = vld [vmem:[#allocation2 + $0xf0] sm:$0xff] }
 0x29c   : > { %v4833_v63 = vld [vmem:[#allocation2 + $0xe0] sm:$0xff] }
 0x29d   : > { %v4836_v22 = vld [vmem:[#allocation2 + $0xf8] sm:$0xff] }
 0x29e   : > { %v4834_v36 = vld [vmem:[#allocation2 + $0xe8] sm:$0xff]  ;;  %v4852_v39 = vpack.c.bf16 %v4836_v22, %v4835_v38 }
 0x29f   : > { %v4851_v37 = vpack.c.bf16 %v4834_v36, %v4833_v63 }
 0x2a1   : > { %6567 = vmatprep.mubr.msk.bf16.mxu1 %vm4772_vm2, %v4851_v37 }
 0x2a2   : > { %6568 = vmatmul.mubr.msk.bf16.gmra.mrb[60].mxu1 %vm4772_vm2, %v4852_v39 }
 0x2a3   : > { %5224 = vmatprep.mubr.bf16.mxu1 %v5189_v45 }
 0x33d   : > { %v6541_v46 = vpop.f32.mrb[32].mxu1 }
 0x33e   : > { %v4967_v0 = vadd.f32 %v6541_v46, %v8089_v11  ;;  %v4958_v47 = vpop.f32.mrb[33].mxu1 }
 0x33f   : > { %v4959_v48 = vadd.f32 %v8089_v11, %v4958_v47  ;;  %v6542_v1 = vpop.f32.mrb[34].mxu1 }
 0x340   : > { %v5087_v49 = vmax.f32 %v4967_v0, 0.0  ;;  %v4970_v50 = vadd.f32 %v6542_v1, %v8089_v11  ;;  %v4961_v2 = vpop.f32.mrb[35].mxu1 }
 0x341   : > { %v5085_v51 = vmax.f32 %v4959_v48, 0.0  ;;  %v4962_v52 = vadd.f32 %v8089_v11, %v4961_v2 }
 0x342   : > { %5120 = vst.msk [vmem:[%s8096_s27 + $0x10] sm:$0xff] %vm5117_vm3, %v5087_v49  ;;  %v5088_v3 = vmax.f32 %v4970_v50, 0.0 }
 0x343   : > { %5118 = vst.msk [vmem:[%s8096_s27] sm:$0xff] %vm5117_vm3, %v5085_v51  ;;  %v5086_v53 = vmax.f32 %v4962_v52, 0.0 }
 0x344   : > { %5121 = vst.msk [vmem:[%s8096_s27 + $0x18] sm:$0xff] %vm5117_vm3, %v5088_v3  ;;  %v8104_v12 = vpack.c.bf16 %v5088_v3, %v5087_v49 }
 0x345   : > { %5119 = vst.msk [vmem:[%s8096_s27 + $0x8] sm:$0xff] %vm5117_vm3, %v5086_v53  ;;  %v8108_v54 = vpack.c.bf16 %v5086_v53, %v5085_v51  ;;  %v6545_v55 = vpop.f32.mrb[36].mxu1 }
 0x346   : > { %v4983_v13 = vadd.f32 %v6545_v55, %v8089_v11  ;;  %v4974_v56 = vpop.f32.mrb[37].mxu1 }
 0x347   : > { %v4975_v57 = vadd.f32 %v8089_v11, %v4974_v56  ;;  %v6546_v14 = vpop.f32.mrb[38].mxu1 }
 0x348   : > { %v5091_v58 = vmax.f32 %v4983_v13, 0.0  ;;  %v4986_v59 = vadd.f32 %v6546_v14, %v8089_v11  ;;  %v4977_v15 = vpop.f32.mrb[39].mxu1 }
 0x349   : > { %v5089_v21 = vmax.f32 %v4975_v57, 0.0  ;;  %v4978_v23 = vadd.f32 %v8089_v11, %v4977_v15 }
 0x34a   : > { %5124 = vst.msk [vmem:[%s8096_s27 + $0x30] sm:$0xff] %vm5117_vm3, %v5091_v58  ;;  %v5092_v24 = vmax.f32 %v4986_v59, 0.0 }
 0x34b   : > { %5122 = vst.msk [vmem:[%s8096_s27 + $0x20] sm:$0xff] %vm5117_vm3, %v5089_v21  ;;  %v5090_v25 = vmax.f32 %v4978_v23, 0.0 }
 0x34c   : > { %5125 = vst.msk [vmem:[%s8096_s27 + $0x38] sm:$0xff] %vm5117_vm3, %v5092_v24  ;;  %v8120_v26 = vpack.c.bf16 %v5092_v24, %v5091_v58 }
 0x34d   : > { %5123 = vst.msk [vmem:[%s8096_s27 + $0x28] sm:$0xff] %vm5117_vm3, %v5090_v25  ;;  %v8124_v4 = vpack.c.bf16 %v5090_v25, %v5089_v21  ;;  %v6549_v27 = vpop.f32.mrb[40].mxu1 }
 0x34e   : > { %v4999_v28 = vadd.f32 %v6549_v27, %v8089_v11  ;;  %v4990_v5 = vpop.f32.mrb[41].mxu1 }
 0x34f   : > { %v4991_v29 = vadd.f32 %v8089_v11, %v4990_v5  ;;  %v6550_v60 = vpop.f32.mrb[42].mxu1 }
 0x350   : > { %v5095_v6 = vmax.f32 %v4999_v28, 0.0  ;;  %v5002_v16 = vadd.f32 %v6550_v60, %v8089_v11  ;;  %v4993_v30 = vpop.f32.mrb[43].mxu1 }
 0x351   : > { %v5093_v31 = vmax.f32 %v4991_v29, 0.0  ;;  %v4994_v17 = vadd.f32 %v8089_v11, %v4993_v30 }
 0x352   : > { %5128 = vst.msk [vmem:[%s8096_s27 + $0x50] sm:$0xff] %vm5117_vm3, %v5095_v6  ;;  %v5096_v7 = vmax.f32 %v5002_v16, 0.0 }
 0x353   : > { %5126 = vst.msk [vmem:[%s8096_s27 + $0x40] sm:$0xff] %vm5117_vm3, %v5093_v31  ;;  %v5094_v61 = vmax.f32 %v4994_v17, 0.0 }
 0x354   : > { %5129 = vst.msk [vmem:[%s8096_s27 + $0x58] sm:$0xff] %vm5117_vm3, %v5096_v7  ;;  %v8136_v18 = vpack.c.bf16 %v5096_v7, %v5095_v6 }
 0x355   : > { %5127 = vst.msk [vmem:[%s8096_s27 + $0x48] sm:$0xff] %vm5117_vm3, %v5094_v61  ;;  %v8140_v32 = vpack.c.bf16 %v5094_v61, %v5093_v31  ;;  %v6553_v20 = vpop.f32.mrb[44].mxu1 }
 0x356   : > { %v5015_v33 = vadd.f32 %v6553_v20, %v8089_v11  ;;  %v5006_v62 = vpop.f32.mrb[45].mxu1 }
 0x357   : > { %v5007_v34 = vadd.f32 %v8089_v11, %v5006_v62  ;;  %v6554_v35 = vpop.f32.mrb[46].mxu1 }
 0x358   : > { %v5099_v22 = vmax.f32 %v5015_v33, 0.0  ;;  %v5018_v63 = vadd.f32 %v6554_v35, %v8089_v11  ;;  %v5009_v36 = vpop.f32.mrb[47].mxu1 }
 0x359   : > { %v5097_v37 = vmax.f32 %v5007_v34, 0.0  ;;  %v5010_v38 = vadd.f32 %v8089_v11, %v5009_v36 }
 0x35a   : > { %5132 = vst.msk [vmem:[%s8096_s27 + $0x70] sm:$0xff] %vm5117_vm3, %v5099_v22  ;;  %v5100_v39 = vmax.f32 %v5018_v63, 0.0 }
 0x35b   : > { %5130 = vst.msk [vmem:[%s8096_s27 + $0x60] sm:$0xff] %vm5117_vm3, %v5097_v37  ;;  %v5098_v40 = vmax.f32 %v5010_v38, 0.0 }
 0x35c   : > { %5133 = vst.msk [vmem:[%s8096_s27 + $0x78] sm:$0xff] %vm5117_vm3, %v5100_v39  ;;  %v8152_v8 = vpack.c.bf16 %v5100_v39, %v5099_v22 }
 0x35d   : > { %5131 = vst.msk [vmem:[%s8096_s27 + $0x68] sm:$0xff] %vm5117_vm3, %v5098_v40  ;;  %v8156_v41 = vpack.c.bf16 %v5098_v40, %v5097_v37  ;;  %v6557_v42 = vpop.f32.mrb[48].mxu1 }
 0x35e   : > { %v5031_v9 = vadd.f32 %v6557_v42, %v8089_v11  ;;  %v5022_v19 = vpop.f32.mrb[49].mxu1 }
 0x35f   : > { %v5023_v45 = vadd.f32 %v8089_v11, %v5022_v19  ;;  %v6558_v46 = vpop.f32.mrb[50].mxu1 }
 0x360   : > { %v5103_v0 = vmax.f32 %v5031_v9, 0.0  ;;  %v5034_v47 = vadd.f32 %v6558_v46, %v8089_v11  ;;  %v5025_v48 = vpop.f32.mrb[51].mxu1 }
 0x361   : > { %v5101_v1 = vmax.f32 %v5023_v45, 0.0  ;;  %v5026_v49 = vadd.f32 %v8089_v11, %v5025_v48 }
 0x362   : > { %5136 = vst.msk [vmem:[%s8096_s27 + $0x90] sm:$0xff] %vm5117_vm3, %v5103_v0  ;;  %v5104_v50 = vmax.f32 %v5034_v47, 0.0 }
 0x363   : > { %5134 = vst.msk [vmem:[%s8096_s27 + $0x80] sm:$0xff] %vm5117_vm3, %v5101_v1  ;;  %v5102_v2 = vmax.f32 %v5026_v49, 0.0 }
 0x364   : > { %5137 = vst.msk [vmem:[%s8096_s27 + $0x98] sm:$0xff] %vm5117_vm3, %v5104_v50  ;;  %v5160_v51 = vpack.c.bf16 %v5104_v50, %v5103_v0 }
 0x365   : > { %5135 = vst.msk [vmem:[%s8096_s27 + $0x88] sm:$0xff] %vm5117_vm3, %v5102_v2  ;;  %v5159_v52 = vpack.c.bf16 %v5102_v2, %v5101_v1  ;;  %v6561_v3 = vpop.f32.mrb[52].mxu1 }
 0x366   : > { %v5047_v53 = vadd.f32 %v6561_v3, %v8089_v11  ;;  %v5038_v55 = vpop.f32.mrb[53].mxu1 }
 0x367   : > { %v5039_v13 = vadd.f32 %v8089_v11, %v5038_v55  ;;  %v6562_v56 = vpop.f32.mrb[54].mxu1  ;;  %6202 = vmatprep.subr.bf16.mxu1 %v5159_v52 }
 0x368   : > { %v5107_v57 = vmax.f32 %v5047_v53, 0.0  ;;  %v5050_v14 = vadd.f32 %v6562_v56, %v8089_v11  ;;  %v5041_v58 = vpop.f32.mrb[55].mxu1  ;;  %6203 = vmatpush3.bf16.msra.mxu1 %v8108_v54 }
 0x369   : > { %v5105_v59 = vmax.f32 %v5039_v13, 0.0  ;;  %v5042_v15 = vadd.f32 %v8089_v11, %v5041_v58  ;;  %6204 = vmatprep.subr.bf16.mxu1 %v5160_v51 }
 0x36a   : > { %5140 = vst.msk [vmem:[%s8096_s27 + $0xb0] sm:$0xff] %vm5117_vm3, %v5107_v57  ;;  %v5108_v21 = vmax.f32 %v5050_v14, 0.0 }
 0x36b   : > { %5138 = vst.msk [vmem:[%s8096_s27 + $0xa0] sm:$0xff] %vm5117_vm3, %v5105_v59  ;;  %v5106_v23 = vmax.f32 %v5042_v15, 0.0 }
 0x36c   : > { %5141 = vst.msk [vmem:[%s8096_s27 + $0xb8] sm:$0xff] %vm5117_vm3, %v5108_v21  ;;  %v5162_v24 = vpack.c.bf16 %v5108_v21, %v5107_v57  ;;  %6205 = vmatpush3.bf16.msra.mxu1 %v8104_v12 }
 0x36d   : > { %5139 = vst.msk [vmem:[%s8096_s27 + $0xa8] sm:$0xff] %vm5117_vm3, %v5106_v23  ;;  %v5161_v25 = vpack.c.bf16 %v5106_v23, %v5105_v59  ;;  %v6565_v54 = vpop.f32.mrb[56].mxu1 }
 0x36e   : > { %v5063_v27 = vadd.f32 %v6565_v54, %v8089_v11  ;;  %v5054_v28 = vpop.f32.mrb[57].mxu1 }
 0x36f   : > { %v5055_v5 = vadd.f32 %v8089_v11, %v5054_v28  ;;  %v6566_v29 = vpop.f32.mrb[58].mxu1  ;;  %6206 = vmatprep.subr.bf16.mxu1 %v5161_v25 }
 0x370   : > { %v5111_v60 = vmax.f32 %v5063_v27, 0.0  ;;  %v5066_v6 = vadd.f32 %v6566_v29, %v8089_v11  ;;  %v5057_v16 = vpop.f32.mrb[59].mxu1  ;;  %6207 = vmatpush3.bf16.msra.mxu1 %v8124_v4 }
 0x371   : > { %v5109_v12 = vmax.f32 %v5055_v5, 0.0  ;;  %v5058_v30 = vadd.f32 %v8089_v11, %v5057_v16  ;;  %6208 = vmatprep.subr.bf16.mxu1 %v5162_v24 }
 0x372   : > { %5144 = vst.msk [vmem:[%s8096_s27 + $0xd0] sm:$0xff] %vm5117_vm3, %v5111_v60  ;;  %v5112_v31 = vmax.f32 %v5066_v6, 0.0 }
 0x373   : > { %5142 = vst.msk [vmem:[%s8096_s27 + $0xc0] sm:$0xff] %vm5117_vm3, %v5109_v12  ;;  %v5110_v17 = vmax.f32 %v5058_v30, 0.0 }
 0x374   : > { %5145 = vst.msk [vmem:[%s8096_s27 + $0xd8] sm:$0xff] %vm5117_vm3, %v5112_v31  ;;  %v5164_v7 = vpack.c.bf16 %v5112_v31, %v5111_v60  ;;  %6209 = vmatpush3.bf16.msra.mxu1 %v8120_v26 }
 0x375   : > { %5143 = vst.msk [vmem:[%s8096_s27 + $0xc8] sm:$0xff] %vm5117_vm3, %v5110_v17  ;;  %v5163_v61 = vpack.c.bf16 %v5110_v17, %v5109_v12  ;;  %v6569_v4 = vpop.f32.mrb[60].mxu1 }
 0x376   : > { %v5079_v20 = vadd.f32 %v6569_v4, %v8089_v11  ;;  %v5070_v33 = vpop.f32.mrb[61].mxu1 }
 0x377   : > { %v5071_v62 = vadd.f32 %v8089_v11, %v5070_v33  ;;  %v6570_v34 = vpop.f32.mrb[62].mxu1  ;;  %6210 = vmatprep.subr.bf16.mxu1 %v5163_v61 }
 0x378   : > { %v5115_v35 = vmax.f32 %v5079_v20, 0.0  ;;  %v5082_v22 = vadd.f32 %v6570_v34, %v8089_v11  ;;  %v5073_v63 = vpop.f32.mrb[63].mxu1  ;;  %6211 = vmatpush3.bf16.msra.mxu1 %v8140_v32  ;;  %v7149_v32 = vmov 0.0  }
 0x379   : > { %v5113_v26 = vmax.f32 %v5071_v62, 0.0  ;;  %v5074_v36 = vadd.f32 %v8089_v11, %v5073_v63  ;;  %6212 = vmatprep.subr.bf16.mxu1 %v5164_v7  ;;  %v7048_v11 = vld [vmem:[%s8321_s6] sm:$0xff]  }
 0x37a   : > { %5148 = vst.msk [vmem:[%s8096_s27 + $0xf0] sm:$0xff] %vm5117_vm3, %v5115_v35  ;;  %v5116_v37 = vmax.f32 %v5082_v22, 0.0 }
 0x37b   : > { %5146 = vst.msk [vmem:[%s8096_s27 + $0xe0] sm:$0xff] %vm5117_vm3, %v5113_v26  ;;  %v5114_v38 = vmax.f32 %v5074_v36, 0.0 }
 0x37c   : > { %5149 = vst.msk [vmem:[%s8096_s27 + $0xf8] sm:$0xff] %vm5117_vm3, %v5116_v37  ;;  %v5166_v39 = vpack.c.bf16 %v5116_v37, %v5115_v35  ;;  %6213 = vmatpush3.bf16.msra.mxu1 %v8136_v18  ;;  %v7049_v18 = vld [vmem:[%s8321_s6 + $0x8] sm:$0xff]  }
 0x37d   : > { %5147 = vst.msk [vmem:[%s8096_s27 + $0xe8] sm:$0xff] %vm5117_vm3, %v5114_v38  ;;  %v5165_v40 = vpack.c.bf16 %v5114_v38, %v5113_v26  ;;  %s7058_s27 = scalar_lea.vmem %s7057_s22, 8192 }
 0x37e   : > { %p7060_p3 = scmp.lt.s32.totalorder %s7058_s27, %s7052_s16 }
 0x37f   : > { %6214 = vmatprep.subr.bf16.mxu1 %v5165_v40 }
 0x380   : > { %6215 = vmatpush3.bf16.msra.mxu1 %v8156_v41  ;;  %p7061_p4 = por %p7060_p3, %p7059_p2 }
 0x381   : > { %6216 = vmatprep.subr.bf16.mxu1 %v5166_v39 }
 0x382   : > { %p7062_p5 = pnand %p7061_p4, %p7055_p1 }
 0x384   : > { %6217 = vmatpush3.bf16.msra.mxu1 %v8152_v8  ;;  %v7050_v8 = vld [vmem:[%s8321_s6 + $0x10] sm:$0xff]  }
 0x385   : > { %6571 = vmatprep.subr.bf16.mxu1 %v7149_v32 }
 0x387   : > { %5225 = vmatmul.mubr.bf16.vlgmr.msra.gmra.mrb[64].mxu1 %v5182_v44 }
 0x388   : > { %6572 = vmatpush3.bf16.msra.mxu1 %v7048_v11  ;;  %6579 = vmatprep.mubr.msk.bf16.mxu1 %vm7150_vm4, %v7149_v32 }
 0x389   : > { %6573 = vmatprep.subr.bf16.mxu1 %v7149_v32 }
 0x38c   : > { %6574 = vmatpush3.bf16.msra.mxu1 %v7049_v18 }
 0x38d   : > { %6575 = vmatprep.subr.bf16.mxu1 %v7149_v32 }
 0x390   : > { %6576 = vmatpush3.bf16.msra.mxu1 %v7050_v8 }
 0x391   : > { %6577 = vmatprep.subr.bf16.mxu1 %v7149_v32 }
 0x394   : > { %6578 = vmatpush3.bf16.msra.mxu1 %v7051_v43 }
 0x45a   : > { %v6218_v10 = vpop.f32.mrb[64].mxu1 }
 0x45b   : > { %v6219_v44 = vpop.f32.mrb[65].mxu1 }
 0x45c   : > { %v6220_v41 = vadd.f32 %v6219_v44, %v6218_v10  ;;  %v6221_v42 = vpop.f32.mrb[66].mxu1 }
 0x45d   : > { %v6222_v9 = vpop.f32.mrb[67].mxu1 }
 0x45e   : > { %v5232_v19 = vpack.c.bf16 %v6220_v41, %v6220_v41 }
 0x460   : > { %6580 = vmatmul.mubr.msk.bf16.vlgmr.msra.gmra.mrb[68].mxu1 %vm5117_vm3, %v5232_v19 }
 0x461   : > { %7065 = shalt.err (!%p7062_p5)
}
 0x462   : > { %s7066_s23 = scalar_lea.hbm %s8235_s14, 4096  ;;  %s7070_s29 = scalar_lea.hbm %s8323_s8, 8192 }
 0x463   : > { %p7067_p7 = scmp.ne.s32.totalorder %s8235_s14, %s7066_s23  ;;  %p7071_p12 = scmp.lt.u32.totalorder %s8235_s14, %s8323_s8 }
 0x464   : > { %p7072_p13 = scmp.lt.u32.totalorder %s7070_s29, %s7066_s23  ;;  %p7074_p1 = scmp.lt.u32.totalorder %s7066_s23, %s8235_s14 }
 0x465   : > { %p7068_p10 = pnand %p7067_p7, %p7244_p6 }
 0x466   : > { %p7073_p0 = por %p7072_p13, %p7071_p12 }
 0x467   : > { %p7069_p11 = pneg %p7068_p10 }
 0x468   : > { %p7075_p2 = por %p7074_p1, %p7073_p0 }
 0x46a   : > { %p7076_p3 = pnand %p7075_p2, %p7069_p11 }
 0x46c   : > { %7079 = shalt.err (!%p7076_p3)
}
 0x46d   : > { %s7152_s16 = smov 128   ;;  %s7153_s27 = smov 8   ;;  %v5241_v45 = vld [vmem:[%s8322_s7] sm:$0x1]  ;;  %vm5309_vm5 = vcmask 73728  }
 0x46e   : > { %6853 = dma.vmem_to_hbm [thread:$0]  (%p7244_p6), %s8237_s25, 4096, %s8235_s14, %s5312_s26, %s7152_s16, %s7152_s16, %s7153_s27  }
 0x46f   : > { %s6026_s23 = sshll.u32 %s7226_s13, 4  ;;  %s1530_s29 = scalar_lea.vmem [#allocation6], %s7563_s17 }
 0x470   : > { %s5345_s21 = sshll.u32 %s1530_s29, 4  ;;  %s8271_s1 = scalar_lea.hbm %s8324_s9, %s6026_s23  ;;  %s8273_s21 = int_to_ptr.vmem [resolvable:$true] %s5345_s21 }
 0x471   : > { %s5317_s13 = scalar_lea.sflag [#allocation7], %s7563_s17  ;;  %s7080_s25 = scalar_lea.vmem %s8273_s21, 16 }
 0x472   : > { %p7081_p4 = scmp.ne.s32.totalorder %s8273_s21, %s7080_s25  ;;  %s7154_s14 = smov [#allocation6]  }
 0x473   : > { %s7084_s26 = sshll.u32 %s7154_s14, 4  ;;  %s7085_s26 = int_to_ptr.vmem [resolvable:$false] %s7084_s26 }
 0x474   : > { %p7082_p5 = pnand %p7081_p4, %p7244_p6  ;;  %s7086_s0 = scalar_lea.vmem %s7085_s26, 32 }
 0x475   : > { %p7087_p10 = scmp.lt.s32.totalorder %s8273_s21, %s7085_s26  ;;  %p7088_p11 = scmp.lt.s32.totalorder %s7086_s0, %s7080_s25 }
 0x476   : > { %p7083_p7 = pneg %p7082_p5 }
 0x477   : > { %p7089_p12 = por %p7088_p11, %p7087_p10 }
 0x479   : > { %p7090_p13 = pnand %p7089_p12, %p7083_p7 }
 0x533   : > { %v5303_v46 = vpop.f32.mrb[68].mxu1 }
 0x534   : > { %v5304_v0 = vadd.f32 %v5303_v46, %v5241_v45  ;;  %v6581_v47 = vpop.f32.mrb[69].mxu1 }
 0x535   : > { %v5306_v48 = vpop.f32.mrb[70].mxu1 }
 0x536   : > { %v6582_v1 = vpop.f32.mrb[71].mxu1  ;;  %5310 = vst.msk [vmem:[%s1530_s29] sm:$0x1] %vm5309_vm5, %v5304_v0 }
 0x537   : > { %7093 = shalt.err (!%p7090_p13)
}
 0x538   : > { %s7094_s17 = scalar_lea.hbm %s8271_s1, 16  ;;  %s7098_s24 = scalar_lea.hbm %s8324_s9, 32 }
 0x539   : > { %p7095_p0 = scmp.ne.s32.totalorder %s8271_s1, %s7094_s17  ;;  %p7099_p3 = scmp.lt.u32.totalorder %s8271_s1, %s8324_s9 }
 0x53a   : > { %p7100_p4 = scmp.lt.u32.totalorder %s7098_s24, %s7094_s17  ;;  %p7102_p7 = scmp.lt.u32.totalorder %s7094_s17, %s8271_s1 }
 0x53b   : > { %p7096_p1 = pnand %p7095_p0, %p7244_p6 }
 0x53c   : > { %p7101_p5 = por %p7100_p4, %p7099_p3 }
 0x53d   : > { %p7097_p2 = pneg %p7096_p1 }
 0x53e   : > { %p7103_p10 = por %p7102_p7, %p7101_p5 }
 0x540   : > { %p7104_p11 = pnand %p7103_p10, %p7097_p2 }
 0x542   : > { %7107 = shalt.err (!%p7104_p11)
}
 0x543   : > { %6854 = dma.vmem_to_hbm [thread:$0]  (%p7244_p6), %s8273_s21, 16, %s8271_s1, %s5317_s13  }
 0x544 PF: > { %s5357_s29 = sand.u32 1, %s7134_s30   ;;  %p6858_p12 = pnand %p5440_p9, %p7248_p8 }
 0x545   : > { %s5358_s22 = scalar_lea.sflag [#allocation5], %s5357_s29 }
 0x546   : > { %7125 = dma.done.wait (!%p6858_p12), %s5358_s22, 4096  }
 0x547   : > { %7127 = vsyncadd (!%p6858_p12), %s5358_s22, 4294963200  ;;  %s5367_s25 = scalar_lea.sflag [#allocation7], %s5357_s29 }
 0x548   : > { %7129 = dma.done.wait (!%p6858_p12), %s5367_s25, 16  }
 0x549   : > { %7131 = vsyncadd (!%p6858_p12), %s5367_s25, 4294967280  ;;  %p23_p6 = scmp.ge.s32.totalorder %s7230_s15, 4   ;;  %s8331_s30 = smov %s7138_s10 }
 0x54a   : > { %s8332_s10 = smov %s7142_s11  ;;  %s8333_s11 = smov %s7242_s18 }
 0x54b   : > { %s8334_s12 = smov %s7230_s15  ;;  %25 = sbr.rel (!%p23_p6) target bundleno = 8 (0x8), region = 166 }
 0x552   :  { %5371 = vsyncpa [#allocation5], 1 }
 0x553   :  { %5373 = vsyncpa [#allocation5 + $0x1], 1 }
 0x554   :  { %5374 = vsyncpa [#allocation7], 1 }
 0x555   :  { %5376 = vsyncpa [#allocation7 + $0x1], 1 }

</bundles_post_ra>
